<compile_context>
chip_gen: v7x
topology: tpu7x:2x2x1
jax: 0.10.0
libtpu: 0.0.40
codegen_flags: <defaults>
</compile_context>

<pallas_src>
import jax
import jax.numpy as jnp
from jax.experimental import pallas as pl
from jax.experimental.pallas import tpu as pltpu

# ----- synthetic hyperparameters mirroring args.* in BachM.__init__ -----
NUM_TOKENS    = (10, 7)     # args.num_tokens  (two token vocabularies)
NEMBS         = (16, 8)     # args.nembs
NHID          = 32          # args.nhid
NLAYERS       = 2           # args.nlayers  (fused kernel hardcodes 2 layers)
NEMB_META     = 8           # args.nemb_meta
META_NFC_CENT = 16          # args.meta_nfc_cent
NFC_LEFT      = 32          # args.nfc_left
PRED_NFC      = 32          # args.pred_nfc
NUM_PITCHES   = 8           # args.num_pitches
NUM_DURATIONS = 4           # args.num_durations
OUT_DIM       = NUM_PITCHES * NUM_DURATIONS
D_IN          = sum(NEMBS)
HEAD_W        = max(PRED_NFC, OUT_DIM)   # common lane width of the head slab

assert NLAYERS == 2, "fused kernel below is written for exactly 2 GRU layers"


# ---------------------------------------------------------------------------
# Single fused Pallas kernel:
#   hoisted layer-0 input-gate matmul, fully-unrolled 2-layer GRU recurrence
#   (hidden states live in vregs), per-row capture of h at t == length-1,
#   then the pre-folded head: relu(last_h@W1 + meta@W2 + b) @ Wp + bp.
# ---------------------------------------------------------------------------
def bachm_fused_kernel(len_ref, x_ref, meta_ref, gru_ref, head_ref, out_ref):
    TB, D = x_ref.shape            # (T*B, D_IN), time-major flattened
    B = out_ref.shape[0]
    T = TB // B
    H = NHID
    G = 3 * H

    # --- carve the packed GRU slab (static slices; 8-row-aligned offsets) ---
    wih0 = gru_ref[0:D, :]                       # (D_IN, 3H)
    whh0 = gru_ref[D:D + H, :]                   # (H, 3H)
    wih1 = gru_ref[D + H:D + 2 * H, :]           # (H, 3H)
    whh1 = gru_ref[D + 2 * H:D + 3 * H, :]       # (H, 3H)
    ob = D + 3 * H
    bx0  = gru_ref[ob + 0:ob + 1, :]                                # (1, 3H)
    bhn0 = jnp.broadcast_to(gru_ref[ob + 1:ob + 2, 0:H], (B, H))    # hoisted
    bx1  = jnp.broadcast_to(gru_ref[ob + 2:ob + 3, :], (B, G))      # broadcasts
    bhn1 = jnp.broadcast_to(gru_ref[ob + 3:ob + 4, 0:H], (B, H))

    lengths = len_ref[...]                       # (B, 1) int32

    # --- hoisted layer-0 input-gate matmul: one (T*B,D)x(D,3H) MXU push ---
    gx0_all = jnp.dot(x_ref[...], wih0,
                      preferred_element_type=jnp.float32) + bx0     # (T*B, 3H)

    def gru_cell(gx, gh, h, bhn):
        # fused r|z sigmoid on the lane-0-aligned [0:2H) block (one EUP push);
        # n-gate keeps bhh_n inside r*(...) as nn.GRU requires.
        s = jax.nn.sigmoid(gx[:, 0:2 * H] + gh[:, 0:2 * H])
        r = s[:, 0:H]
        z = s[:, H:2 * H]
        n = jnp.tanh(gx[:, 2 * H:G] + r * (gh[:, 2 * H:G] + bhn))
        return (1.0 - z) * n + z * h

    h0 = jnp.zeros((B, H), jnp.float32)
    h1 = jnp.zeros((B, H), jnp.float32)
    last_h = jnp.zeros((B, H), jnp.float32)
    # Fully unrolled recurrence (T is small); Python-int t => static slices.
    for t in range(T):
        gx0 = gx0_all[t * B:(t + 1) * B, :]
        gh0 = jnp.dot(h0, whh0, preferred_element_type=jnp.float32)
        h0 = gru_cell(gx0, gh0, h0, bhn0)
        gx1 = jnp.dot(h0, wih1, preferred_element_type=jnp.float32) + bx1
        gh1 = jnp.dot(h1, whh1, preferred_element_type=jnp.float32)
        h1 = gru_cell(gx1, gh1, h1, bhn1)
        # packed-sequence + gather(length-1) semantics: capture h1 at the
        # last valid timestep of each row.
        last_h = jnp.where(lengths == (t + 1), h1, last_h)

    # --- pre-folded linear head (exact: dropout is identity at inference) ---
    W1 = head_ref[0:H, 0:PRED_NFC]                                  # (H, P)
    Wp = head_ref[H:H + PRED_NFC, 0:OUT_DIM]                        # (P, O)
    W2 = head_ref[H + PRED_NFC:H + PRED_NFC + NEMB_META, 0:PRED_NFC]
    ob2 = H + PRED_NFC + NEMB_META
    b_h = head_ref[ob2:ob2 + 1, 0:PRED_NFC]                         # (1, P)
    b_p = head_ref[ob2 + 1:ob2 + 2, 0:OUT_DIM]                      # (1, O)

    hid = (jnp.dot(last_h, W1, preferred_element_type=jnp.float32)
           + jnp.dot(meta_ref[...], W2, preferred_element_type=jnp.float32)
           + b_h)
    hid = jnp.maximum(hid, 0.0)
    out_ref[...] = jnp.dot(hid, Wp, preferred_element_type=jnp.float32) + b_p


def bachm_fused(packed, x_flat, lengths_b1, meta_emb):
    """x_flat: (T*B, D_IN) time-major flattened; lengths_b1: (B,1) int32;
    meta_emb: (B, NEMB_META)."""
    B = lengths_b1.shape[0]
    vmem = pl.BlockSpec(memory_space=pltpu.MemorySpace.VMEM)
    args = (lengths_b1, x_flat, meta_emb,
            packed["gru_slab"], packed["head_slab"])
    return pl.pallas_call(
        bachm_fused_kernel,
        out_shape=jax.ShapeDtypeStruct((B, OUT_DIM), jnp.float32),
        in_specs=[vmem] * len(args),
        out_specs=vmem,
    )(*args)


# ---------------------------------------------------------------------------
# Parameter init (deterministic, synthetic) — mirrors the nn.Module params.
# ---------------------------------------------------------------------------
def _uniform(key, shape, scale=0.1):
    return jax.random.uniform(key, shape, jnp.float32, -scale, scale)


def init_params(key):
    keys = iter(jax.random.split(key, 64))
    params = {}
    # token embeddings (nn.Embedding per vocabulary)
    params["enc"] = [_uniform(next(keys), (nt, ne))
                     for ne, nt in zip(NEMBS, NUM_TOKENS)]
    # meta embedding (16, nemb_meta)
    params["meta_emb"] = _uniform(next(keys), (16, NEMB_META))
    # GRU layers: gate-stacked (in, 3H) weights (gate order r, z, n),
    # r/z biases pre-folded (bih+bhh); the n-gate's bhh stays separate.
    params["gru"] = []
    d_in, H = D_IN, NHID
    for _ in range(NLAYERS):
        wih = _uniform(next(keys), (d_in, 3 * H))
        whh = _uniform(next(keys), (H, 3 * H))
        bih = _uniform(next(keys), (1, 3 * H))
        bhh = _uniform(next(keys), (1, 3 * H))
        b_x = jnp.concatenate(
            [bih[:, :2 * H] + bhh[:, :2 * H], bih[:, 2 * H:]], axis=1)
        b_hn = bhh[:, 2 * H:]
        params["gru"].append({"wih": wih, "whh": whh, "b_x": b_x, "b_hn": b_hn})
        d_in = H
    # head linears (stored as (in, out)); fc split into left/meta row blocks
    params["w_left"] = _uniform(next(keys), (NHID, NFC_LEFT))
    params["b_left"] = _uniform(next(keys), (1, NFC_LEFT))
    params["w_meta"] = _uniform(next(keys), (NEMB_META, META_NFC_CENT))
    params["b_meta"] = _uniform(next(keys), (1, META_NFC_CENT))
    params["w_fc_l"] = _uniform(next(keys), (NFC_LEFT, PRED_NFC))
    params["w_fc_m"] = _uniform(next(keys), (META_NFC_CENT, PRED_NFC))
    params["b_fc"] = _uniform(next(keys), (1, PRED_NFC))
    params["w_pred"] = _uniform(next(keys), (PRED_NFC, OUT_DIM))
    params["b_pred"] = _uniform(next(keys), (1, OUT_DIM))
    return params


def pack_params(p):
    """Pre-fold the linear head and pack all kernel params into 2 f32 slabs."""
    H, D, G = NHID, D_IN, 3 * NHID
    g0, g1 = p["gru"]

    def pad_cols(a, width):
        return jnp.pad(a, ((0, 0), (0, width - a.shape[1])))

    # GRU slab: weight blocks at 8-aligned row offsets, then the 4 bias rows.
    gru_slab = jnp.concatenate([
        g0["wih"], g0["whh"], g1["wih"], g1["whh"],
        g0["b_x"], pad_cols(g0["b_hn"], G),
        g1["b_x"], pad_cols(g1["b_hn"], G),
    ], axis=0).astype(jnp.float32)                     # (D_IN + 3H + 4, 3H)

    # Exact head pre-fold (no activation/dropout between left_fc/meta_fc & fc).
    hp = jax.lax.Precision.HIGHEST
    W1 = jnp.dot(p["w_left"], p["w_fc_l"], precision=hp)      # (NHID, PRED_NFC)
    W2 = jnp.dot(p["w_meta"], p["w_fc_m"], precision=hp)      # (NEMB_META, PRED_NFC)
    b = (jnp.dot(p["b_left"], p["w_fc_l"], precision=hp)
         + jnp.dot(p["b_meta"], p["w_fc_m"], precision=hp)
         + p["b_fc"])                                          # (1, PRED_NFC)
    head_slab = jnp.concatenate([
        pad_cols(W1, HEAD_W), pad_cols(p["w_pred"], HEAD_W),
        pad_cols(W2, HEAD_W), pad_cols(b, HEAD_W), pad_cols(p["b_pred"], HEAD_W),
    ], axis=0).astype(jnp.float32)        # (NHID + PRED_NFC + NEMB_META + 2, HEAD_W)

    return {"enc": p["enc"], "meta_tbl": p["meta_emb"],
            "gru_slab": gru_slab, "head_slab": head_slab}


# ---------------------------------------------------------------------------
# Forward pass (mirrors BachM.forward / SeqBaseModel.seq, inference mode)
# ---------------------------------------------------------------------------
def bachm_forward(packed, self_left, self_length, meta_central):
    B, T, _ = self_left.shape
    # embedding lookups + concat (glue, done in JAX)
    embs = [packed["enc"][i][self_left[:, :, i]] for i in range(len(NUM_TOKENS))]
    x = jnp.concatenate(embs, axis=-1)                      # (B, T, D_IN)
    x = jnp.transpose(x, (1, 0, 2)).reshape(T * B, D_IN)    # time-major, flat
    # meta embedding lookup (glue)
    meta_emb = packed["meta_tbl"][meta_central]             # (B, NEMB_META)
    # NOTE: lengths must satisfy 1 <= length <= T (pack_padded_sequence would
    # reject anything else); rows violating this would silently get last_h=0.
    lengths = self_length.astype(jnp.int32).reshape(B, 1)

    # single fused kernel: hoisted input matmul + 2-layer GRU recurrence
    # + last-valid-step capture + pre-folded head.
    pred = bachm_fused(packed, x, lengths, meta_emb)
    return pred, None


if __name__ == "__main__":
    key = jax.random.PRNGKey(0)
    k_param, k_tok, k_meta = jax.random.split(key, 3)

    params = init_params(k_param)
    packed = pack_params(params)

    B, T = 2, 8
    # self_left: (B, T, num_token_streams) integer ids, one column per vocab
    cols = []
    for i, nt in enumerate(NUM_TOKENS):
        cols.append(jax.random.randint(jax.random.fold_in(k_tok, i),
                                       (B, T, 1), 0, nt, jnp.int32))
    self_left = jnp.concatenate(cols, axis=-1)                 # (2, 8, 2)
    self_length = jnp.array([8, 5], dtype=jnp.int32)           # descending (packed)
    meta_central = jax.random.randint(k_meta, (B,), 0, 16, jnp.int32)

    # mirror pack_padded_sequence's implicit validity requirement
    assert int(self_length.min()) >= 1 and int(self_length.max()) <= T

    pred, _ = bachm_forward(packed, self_left, self_length, meta_central)
    pred = jax.block_until_ready(pred)
    assert pred.shape == (B, OUT_DIM)
    assert bool(jnp.all(jnp.isfinite(pred)))
    print("KERNEL_OK")
</pallas_src>

<mosaic_0001>
module attributes {stable_mosaic.version = 11 : i64} {
  func.func @bachm_fused_kernel(%arg0: memref<2x1xi32, #tpu.memory_space<vmem>>, %arg1: memref<16x24xf32, #tpu.memory_space<vmem>>, %arg2: memref<2x8xf32, #tpu.memory_space<vmem>>, %arg3: memref<124x96xf32, #tpu.memory_space<vmem>>, %arg4: memref<74x32xf32, #tpu.memory_space<vmem>>, %arg5: memref<2x32xf32, #tpu.memory_space<vmem>>) attributes {dimension_semantics = [], scalar_prefetch = 0 : i64, scratch_operands = 0 : i64, tpu.core_type = #tpu.core_type<tc>} {
    %c0 = arith.constant 0 : index
    %c0_0 = arith.constant 0 : index
    %0 = vector.load %arg3[%c0, %c0_0] : memref<124x96xf32, #tpu.memory_space<vmem>>, vector<24x96xf32>
    %c24 = arith.constant 24 : index
    %c0_1 = arith.constant 0 : index
    %1 = vector.load %arg3[%c24, %c0_1] : memref<124x96xf32, #tpu.memory_space<vmem>>, vector<32x96xf32>
    %c56 = arith.constant 56 : index
    %c0_2 = arith.constant 0 : index
    %2 = vector.load %arg3[%c56, %c0_2] : memref<124x96xf32, #tpu.memory_space<vmem>>, vector<32x96xf32>
    %c88 = arith.constant 88 : index
    %c0_3 = arith.constant 0 : index
    %3 = vector.load %arg3[%c88, %c0_3] : memref<124x96xf32, #tpu.memory_space<vmem>>, vector<32x96xf32>
    %c120 = arith.constant 120 : index
    %c0_4 = arith.constant 0 : index
    %4 = vector.load %arg3[%c120, %c0_4] : memref<124x96xf32, #tpu.memory_space<vmem>>, vector<1x96xf32>
    %c121 = arith.constant 121 : index
    %c0_5 = arith.constant 0 : index
    %5 = vector.load %arg3[%c121, %c0_5] : memref<124x96xf32, #tpu.memory_space<vmem>>, vector<1x32xf32>
    %6 = vector.shape_cast %5 : vector<1x32xf32> to vector<1x32xf32>
    %7 = vector.broadcast %6 : vector<1x32xf32> to vector<2x32xf32>
    %c122 = arith.constant 122 : index
    %c0_6 = arith.constant 0 : index
    %8 = vector.load %arg3[%c122, %c0_6] : memref<124x96xf32, #tpu.memory_space<vmem>>, vector<1x96xf32>
    %9 = vector.shape_cast %8 : vector<1x96xf32> to vector<1x96xf32>
    %10 = vector.broadcast %9 : vector<1x96xf32> to vector<2x96xf32>
    %c123 = arith.constant 123 : index
    %c0_7 = arith.constant 0 : index
    %11 = vector.load %arg3[%c123, %c0_7] : memref<124x96xf32, #tpu.memory_space<vmem>>, vector<1x32xf32>
    %12 = vector.shape_cast %11 : vector<1x32xf32> to vector<1x32xf32>
    %13 = vector.broadcast %12 : vector<1x32xf32> to vector<2x32xf32>
    %c0_8 = arith.constant 0 : index
    %c0_9 = arith.constant 0 : index
    %14 = vector.load %arg0[%c0_8, %c0_9] : memref<2x1xi32, #tpu.memory_space<vmem>>, vector<2x1xi32>
    %c0_10 = arith.constant 0 : index
    %c0_11 = arith.constant 0 : index
    %15 = vector.load %arg1[%c0_10, %c0_11] : memref<16x24xf32, #tpu.memory_space<vmem>>, vector<16x24xf32>
    %cst = arith.constant dense<0.000000e+00> : vector<16x96xf32>
    %16 = tpu.matmul %15, %0, %cst {dimension_numbers = #tpu.dot_dimension_numbers<[1], [0], [0], [1], [0, 0, 1, 1], [], []>} : vector<16x24xf32>, vector<24x96xf32>, vector<16x96xf32> -> vector<16x96xf32>
    %17 = vector.broadcast %4 : vector<1x96xf32> to vector<16x96xf32>
    %18 = arith.addf %16, %17 : vector<16x96xf32>
    %cst_12 = arith.constant 0.000000e+00 : f32
    %19 = vector.broadcast %cst_12 : f32 to vector<2x32xf32>
    %cst_13 = arith.constant 0.000000e+00 : f32
    %20 = vector.broadcast %cst_13 : f32 to vector<2x32xf32>
    %cst_14 = arith.constant 0.000000e+00 : f32
    %21 = vector.broadcast %cst_14 : f32 to vector<2x32xf32>
    %22 = vector.extract_strided_slice %18 {offsets = [0, 0], sizes = [2, 96], strides = [1, 1]} : vector<16x96xf32> to vector<2x96xf32>
    %cst_15 = arith.constant dense<0.000000e+00> : vector<2x96xf32>
    %23 = tpu.matmul %19, %1, %cst_15 {dimension_numbers = #tpu.dot_dimension_numbers<[1], [0], [0], [1], [0, 0, 1, 1], [], []>} : vector<2x32xf32>, vector<32x96xf32>, vector<2x96xf32> -> vector<2x96xf32>
    %24 = vector.extract_strided_slice %22 {offsets = [0, 0], sizes = [2, 64], strides = [1, 1]} : vector<2x96xf32> to vector<2x64xf32>
    %25 = vector.extract_strided_slice %23 {offsets = [0, 0], sizes = [2, 64], strides = [1, 1]} : vector<2x96xf32> to vector<2x64xf32>
    %26 = arith.addf %24, %25 : vector<2x64xf32>
    %27 = arith.negf %26 : vector<2x64xf32>
    %28 = math.exp %27 : vector<2x64xf32>
    %cst_16 = arith.constant 1.000000e+00 : f32
    %29 = vector.broadcast %cst_16 : f32 to vector<2x64xf32>
    %30 = arith.addf %29, %28 : vector<2x64xf32>
    %31 = arith.divf %29, %30 : vector<2x64xf32>
    %32 = vector.extract_strided_slice %31 {offsets = [0, 0], sizes = [2, 32], strides = [1, 1]} : vector<2x64xf32> to vector<2x32xf32>
    %33 = vector.extract_strided_slice %31 {offsets = [0, 32], sizes = [2, 32], strides = [1, 1]} : vector<2x64xf32> to vector<2x32xf32>
    %34 = vector.extract_strided_slice %22 {offsets = [0, 64], sizes = [2, 32], strides = [1, 1]} : vector<2x96xf32> to vector<2x32xf32>
    %35 = vector.extract_strided_slice %23 {offsets = [0, 64], sizes = [2, 32], strides = [1, 1]} : vector<2x96xf32> to vector<2x32xf32>
    %36 = arith.addf %35, %7 : vector<2x32xf32>
    %37 = arith.mulf %32, %36 : vector<2x32xf32>
    %38 = arith.addf %34, %37 : vector<2x32xf32>
    %39 = math.tanh %38 : vector<2x32xf32>
    %cst_17 = arith.constant 1.000000e+00 : f32
    %40 = vector.broadcast %cst_17 : f32 to vector<2x32xf32>
    %41 = arith.subf %40, %33 : vector<2x32xf32>
    %42 = arith.mulf %41, %39 : vector<2x32xf32>
    %43 = arith.mulf %33, %19 : vector<2x32xf32>
    %44 = arith.addf %42, %43 : vector<2x32xf32>
    %cst_18 = arith.constant dense<0.000000e+00> : vector<2x96xf32>
    %45 = tpu.matmul %44, %2, %cst_18 {dimension_numbers = #tpu.dot_dimension_numbers<[1], [0], [0], [1], [0, 0, 1, 1], [], []>} : vector<2x32xf32>, vector<32x96xf32>, vector<2x96xf32> -> vector<2x96xf32>
    %46 = arith.addf %45, %10 : vector<2x96xf32>
    %cst_19 = arith.constant dense<0.000000e+00> : vector<2x96xf32>
    %47 = tpu.matmul %20, %3, %cst_19 {dimension_numbers = #tpu.dot_dimension_numbers<[1], [0], [0], [1], [0, 0, 1, 1], [], []>} : vector<2x32xf32>, vector<32x96xf32>, vector<2x96xf32> -> vector<2x96xf32>
    %48 = vector.extract_strided_slice %46 {offsets = [0, 0], sizes = [2, 64], strides = [1, 1]} : vector<2x96xf32> to vector<2x64xf32>
    %49 = vector.extract_strided_slice %47 {offsets = [0, 0], sizes = [2, 64], strides = [1, 1]} : vector<2x96xf32> to vector<2x64xf32>
    %50 = arith.addf %48, %49 : vector<2x64xf32>
    %51 = arith.negf %50 : vector<2x64xf32>
    %52 = math.exp %51 : vector<2x64xf32>
    %cst_20 = arith.constant 1.000000e+00 : f32
    %53 = vector.broadcast %cst_20 : f32 to vector<2x64xf32>
    %54 = arith.addf %53, %52 : vector<2x64xf32>
    %55 = arith.divf %53, %54 : vector<2x64xf32>
    %56 = vector.extract_strided_slice %55 {offsets = [0, 0], sizes = [2, 32], strides = [1, 1]} : vector<2x64xf32> to vector<2x32xf32>
    %57 = vector.extract_strided_slice %55 {offsets = [0, 32], sizes = [2, 32], strides = [1, 1]} : vector<2x64xf32> to vector<2x32xf32>
    %58 = vector.extract_strided_slice %46 {offsets = [0, 64], sizes = [2, 32], strides = [1, 1]} : vector<2x96xf32> to vector<2x32xf32>
    %59 = vector.extract_strided_slice %47 {offsets = [0, 64], sizes = [2, 32], strides = [1, 1]} : vector<2x96xf32> to vector<2x32xf32>
    %60 = arith.addf %59, %13 : vector<2x32xf32>
    %61 = arith.mulf %56, %60 : vector<2x32xf32>
    %62 = arith.addf %58, %61 : vector<2x32xf32>
    %63 = math.tanh %62 : vector<2x32xf32>
    %cst_21 = arith.constant 1.000000e+00 : f32
    %64 = vector.broadcast %cst_21 : f32 to vector<2x32xf32>
    %65 = arith.subf %64, %57 : vector<2x32xf32>
    %66 = arith.mulf %65, %63 : vector<2x32xf32>
    %67 = arith.mulf %57, %20 : vector<2x32xf32>
    %68 = arith.addf %66, %67 : vector<2x32xf32>
    %c1_i32 = arith.constant 1 : i32
    %69 = vector.broadcast %c1_i32 : i32 to vector<2x1xi32>
    %70 = arith.cmpi eq, %14, %69 : vector<2x1xi32>
    %71 = vector.shape_cast %70 : vector<2x1xi1> to vector<2x1xi1>
    %72 = vector.broadcast %71 : vector<2x1xi1> to vector<2x32xi1>
    %73 = arith.select %72, %68, %21 : vector<2x32xi1>, vector<2x32xf32>
    %74 = vector.extract_strided_slice %18 {offsets = [2, 0], sizes = [2, 96], strides = [1, 1]} : vector<16x96xf32> to vector<2x96xf32>
    %cst_22 = arith.constant dense<0.000000e+00> : vector<2x96xf32>
    %75 = tpu.matmul %44, %1, %cst_22 {dimension_numbers = #tpu.dot_dimension_numbers<[1], [0], [0], [1], [0, 0, 1, 1], [], []>} : vector<2x32xf32>, vector<32x96xf32>, vector<2x96xf32> -> vector<2x96xf32>
    %76 = vector.extract_strided_slice %74 {offsets = [0, 0], sizes = [2, 64], strides = [1, 1]} : vector<2x96xf32> to vector<2x64xf32>
    %77 = vector.extract_strided_slice %75 {offsets = [0, 0], sizes = [2, 64], strides = [1, 1]} : vector<2x96xf32> to vector<2x64xf32>
    %78 = arith.addf %76, %77 : vector<2x64xf32>
    %79 = arith.negf %78 : vector<2x64xf32>
    %80 = math.exp %79 : vector<2x64xf32>
    %cst_23 = arith.constant 1.000000e+00 : f32
    %81 = vector.broadcast %cst_23 : f32 to vector<2x64xf32>
    %82 = arith.addf %81, %80 : vector<2x64xf32>
    %83 = arith.divf %81, %82 : vector<2x64xf32>
    %84 = vector.extract_strided_slice %83 {offsets = [0, 0], sizes = [2, 32], strides = [1, 1]} : vector<2x64xf32> to vector<2x32xf32>
    %85 = vector.extract_strided_slice %83 {offsets = [0, 32], sizes = [2, 32], strides = [1, 1]} : vector<2x64xf32> to vector<2x32xf32>
    %86 = vector.extract_strided_slice %74 {offsets = [0, 64], sizes = [2, 32], strides = [1, 1]} : vector<2x96xf32> to vector<2x32xf32>
    %87 = vector.extract_strided_slice %75 {offsets = [0, 64], sizes = [2, 32], strides = [1, 1]} : vector<2x96xf32> to vector<2x32xf32>
    %88 = arith.addf %87, %7 : vector<2x32xf32>
    %89 = arith.mulf %84, %88 : vector<2x32xf32>
    %90 = arith.addf %86, %89 : vector<2x32xf32>
    %91 = math.tanh %90 : vector<2x32xf32>
    %cst_24 = arith.constant 1.000000e+00 : f32
    %92 = vector.broadcast %cst_24 : f32 to vector<2x32xf32>
    %93 = arith.subf %92, %85 : vector<2x32xf32>
    %94 = arith.mulf %93, %91 : vector<2x32xf32>
    %95 = arith.mulf %85, %44 : vector<2x32xf32>
    %96 = arith.addf %94, %95 : vector<2x32xf32>
    %cst_25 = arith.constant dense<0.000000e+00> : vector<2x96xf32>
    %97 = tpu.matmul %96, %2, %cst_25 {dimension_numbers = #tpu.dot_dimension_numbers<[1], [0], [0], [1], [0, 0, 1, 1], [], []>} : vector<2x32xf32>, vector<32x96xf32>, vector<2x96xf32> -> vector<2x96xf32>
    %98 = arith.addf %97, %10 : vector<2x96xf32>
    %cst_26 = arith.constant dense<0.000000e+00> : vector<2x96xf32>
    %99 = tpu.matmul %68, %3, %cst_26 {dimension_numbers = #tpu.dot_dimension_numbers<[1], [0], [0], [1], [0, 0, 1, 1], [], []>} : vector<2x32xf32>, vector<32x96xf32>, vector<2x96xf32> -> vector<2x96xf32>
    %100 = vector.extract_strided_slice %98 {offsets = [0, 0], sizes = [2, 64], strides = [1, 1]} : vector<2x96xf32> to vector<2x64xf32>
    %101 = vector.extract_strided_slice %99 {offsets = [0, 0], sizes = [2, 64], strides = [1, 1]} : vector<2x96xf32> to vector<2x64xf32>
    %102 = arith.addf %100, %101 : vector<2x64xf32>
    %103 = arith.negf %102 : vector<2x64xf32>
    %104 = math.exp %103 : vector<2x64xf32>
    %cst_27 = arith.constant 1.000000e+00 : f32
    %105 = vector.broadcast %cst_27 : f32 to vector<2x64xf32>
    %106 = arith.addf %105, %104 : vector<2x64xf32>
    %107 = arith.divf %105, %106 : vector<2x64xf32>
    %108 = vector.extract_strided_slice %107 {offsets = [0, 0], sizes = [2, 32], strides = [1, 1]} : vector<2x64xf32> to vector<2x32xf32>
    %109 = vector.extract_strided_slice %107 {offsets = [0, 32], sizes = [2, 32], strides = [1, 1]} : vector<2x64xf32> to vector<2x32xf32>
    %110 = vector.extract_strided_slice %98 {offsets = [0, 64], sizes = [2, 32], strides = [1, 1]} : vector<2x96xf32> to vector<2x32xf32>
    %111 = vector.extract_strided_slice %99 {offsets = [0, 64], sizes = [2, 32], strides = [1, 1]} : vector<2x96xf32> to vector<2x32xf32>
    %112 = arith.addf %111, %13 : vector<2x32xf32>
    %113 = arith.mulf %108, %112 : vector<2x32xf32>
    %114 = arith.addf %110, %113 : vector<2x32xf32>
    %115 = math.tanh %114 : vector<2x32xf32>
    %cst_28 = arith.constant 1.000000e+00 : f32
    %116 = vector.broadcast %cst_28 : f32 to vector<2x32xf32>
    %117 = arith.subf %116, %109 : vector<2x32xf32>
    %118 = arith.mulf %117, %115 : vector<2x32xf32>
    %119 = arith.mulf %109, %68 : vector<2x32xf32>
    %120 = arith.addf %118, %119 : vector<2x32xf32>
    %c2_i32 = arith.constant 2 : i32
    %121 = vector.broadcast %c2_i32 : i32 to vector<2x1xi32>
    %122 = arith.cmpi eq, %14, %121 : vector<2x1xi32>
    %123 = vector.shape_cast %122 : vector<2x1xi1> to vector<2x1xi1>
    %124 = vector.broadcast %123 : vector<2x1xi1> to vector<2x32xi1>
    %125 = arith.select %124, %120, %73 : vector<2x32xi1>, vector<2x32xf32>
    %126 = vector.extract_strided_slice %18 {offsets = [4, 0], sizes = [2, 96], strides = [1, 1]} : vector<16x96xf32> to vector<2x96xf32>
    %cst_29 = arith.constant dense<0.000000e+00> : vector<2x96xf32>
    %127 = tpu.matmul %96, %1, %cst_29 {dimension_numbers = #tpu.dot_dimension_numbers<[1], [0], [0], [1], [0, 0, 1, 1], [], []>} : vector<2x32xf32>, vector<32x96xf32>, vector<2x96xf32> -> vector<2x96xf32>
    %128 = vector.extract_strided_slice %126 {offsets = [0, 0], sizes = [2, 64], strides = [1, 1]} : vector<2x96xf32> to vector<2x64xf32>
    %129 = vector.extract_strided_slice %127 {offsets = [0, 0], sizes = [2, 64], strides = [1, 1]} : vector<2x96xf32> to vector<2x64xf32>
    %130 = arith.addf %128, %129 : vector<2x64xf32>
    %131 = arith.negf %130 : vector<2x64xf32>
    %132 = math.exp %131 : vector<2x64xf32>
    %cst_30 = arith.constant 1.000000e+00 : f32
    %133 = vector.broadcast %cst_30 : f32 to vector<2x64xf32>
    %134 = arith.addf %133, %132 : vector<2x64xf32>
    %135 = arith.divf %133, %134 : vector<2x64xf32>
    %136 = vector.extract_strided_slice %135 {offsets = [0, 0], sizes = [2, 32], strides = [1, 1]} : vector<2x64xf32> to vector<2x32xf32>
    %137 = vector.extract_strided_slice %135 {offsets = [0, 32], sizes = [2, 32], strides = [1, 1]} : vector<2x64xf32> to vector<2x32xf32>
    %138 = vector.extract_strided_slice %126 {offsets = [0, 64], sizes = [2, 32], strides = [1, 1]} : vector<2x96xf32> to vector<2x32xf32>
    %139 = vector.extract_strided_slice %127 {offsets = [0, 64], sizes = [2, 32], strides = [1, 1]} : vector<2x96xf32> to vector<2x32xf32>
    %140 = arith.addf %139, %7 : vector<2x32xf32>
    %141 = arith.mulf %136, %140 : vector<2x32xf32>
    %142 = arith.addf %138, %141 : vector<2x32xf32>
    %143 = math.tanh %142 : vector<2x32xf32>
    %cst_31 = arith.constant 1.000000e+00 : f32
    %144 = vector.broadcast %cst_31 : f32 to vector<2x32xf32>
    %145 = arith.subf %144, %137 : vector<2x32xf32>
    %146 = arith.mulf %145, %143 : vector<2x32xf32>
    %147 = arith.mulf %137, %96 : vector<2x32xf32>
    %148 = arith.addf %146, %147 : vector<2x32xf32>
    %cst_32 = arith.constant dense<0.000000e+00> : vector<2x96xf32>
    %149 = tpu.matmul %148, %2, %cst_32 {dimension_numbers = #tpu.dot_dimension_numbers<[1], [0], [0], [1], [0, 0, 1, 1], [], []>} : vector<2x32xf32>, vector<32x96xf32>, vector<2x96xf32> -> vector<2x96xf32>
    %150 = arith.addf %149, %10 : vector<2x96xf32>
    %cst_33 = arith.constant dense<0.000000e+00> : vector<2x96xf32>
    %151 = tpu.matmul %120, %3, %cst_33 {dimension_numbers = #tpu.dot_dimension_numbers<[1], [0], [0], [1], [0, 0, 1, 1], [], []>} : vector<2x32xf32>, vector<32x96xf32>, vector<2x96xf32> -> vector<2x96xf32>
    %152 = vector.extract_strided_slice %150 {offsets = [0, 0], sizes = [2, 64], strides = [1, 1]} : vector<2x96xf32> to vector<2x64xf32>
    %153 = vector.extract_strided_slice %151 {offsets = [0, 0], sizes = [2, 64], strides = [1, 1]} : vector<2x96xf32> to vector<2x64xf32>
    %154 = arith.addf %152, %153 : vector<2x64xf32>
    %155 = arith.negf %154 : vector<2x64xf32>
    %156 = math.exp %155 : vector<2x64xf32>
    %cst_34 = arith.constant 1.000000e+00 : f32
    %157 = vector.broadcast %cst_34 : f32 to vector<2x64xf32>
    %158 = arith.addf %157, %156 : vector<2x64xf32>
    %159 = arith.divf %157, %158 : vector<2x64xf32>
    %160 = vector.extract_strided_slice %159 {offsets = [0, 0], sizes = [2, 32], strides = [1, 1]} : vector<2x64xf32> to vector<2x32xf32>
    %161 = vector.extract_strided_slice %159 {offsets = [0, 32], sizes = [2, 32], strides = [1, 1]} : vector<2x64xf32> to vector<2x32xf32>
    %162 = vector.extract_strided_slice %150 {offsets = [0, 64], sizes = [2, 32], strides = [1, 1]} : vector<2x96xf32> to vector<2x32xf32>
    %163 = vector.extract_strided_slice %151 {offsets = [0, 64], sizes = [2, 32], strides = [1, 1]} : vector<2x96xf32> to vector<2x32xf32>
    %164 = arith.addf %163, %13 : vector<2x32xf32>
    %165 = arith.mulf %160, %164 : vector<2x32xf32>
    %166 = arith.addf %162, %165 : vector<2x32xf32>
    %167 = math.tanh %166 : vector<2x32xf32>
    %cst_35 = arith.constant 1.000000e+00 : f32
    %168 = vector.broadcast %cst_35 : f32 to vector<2x32xf32>
    %169 = arith.subf %168, %161 : vector<2x32xf32>
    %170 = arith.mulf %169, %167 : vector<2x32xf32>
    %171 = arith.mulf %161, %120 : vector<2x32xf32>
    %172 = arith.addf %170, %171 : vector<2x32xf32>
    %c3_i32 = arith.constant 3 : i32
    %173 = vector.broadcast %c3_i32 : i32 to vector<2x1xi32>
    %174 = arith.cmpi eq, %14, %173 : vector<2x1xi32>
    %175 = vector.shape_cast %174 : vector<2x1xi1> to vector<2x1xi1>
    %176 = vector.broadcast %175 : vector<2x1xi1> to vector<2x32xi1>
    %177 = arith.select %176, %172, %125 : vector<2x32xi1>, vector<2x32xf32>
    %178 = vector.extract_strided_slice %18 {offsets = [6, 0], sizes = [2, 96], strides = [1, 1]} : vector<16x96xf32> to vector<2x96xf32>
    %cst_36 = arith.constant dense<0.000000e+00> : vector<2x96xf32>
    %179 = tpu.matmul %148, %1, %cst_36 {dimension_numbers = #tpu.dot_dimension_numbers<[1], [0], [0], [1], [0, 0, 1, 1], [], []>} : vector<2x32xf32>, vector<32x96xf32>, vector<2x96xf32> -> vector<2x96xf32>
    %180 = vector.extract_strided_slice %178 {offsets = [0, 0], sizes = [2, 64], strides = [1, 1]} : vector<2x96xf32> to vector<2x64xf32>
    %181 = vector.extract_strided_slice %179 {offsets = [0, 0], sizes = [2, 64], strides = [1, 1]} : vector<2x96xf32> to vector<2x64xf32>
    %182 = arith.addf %180, %181 : vector<2x64xf32>
    %183 = arith.negf %182 : vector<2x64xf32>
    %184 = math.exp %183 : vector<2x64xf32>
    %cst_37 = arith.constant 1.000000e+00 : f32
    %185 = vector.broadcast %cst_37 : f32 to vector<2x64xf32>
    %186 = arith.addf %185, %184 : vector<2x64xf32>
    %187 = arith.divf %185, %186 : vector<2x64xf32>
    %188 = vector.extract_strided_slice %187 {offsets = [0, 0], sizes = [2, 32], strides = [1, 1]} : vector<2x64xf32> to vector<2x32xf32>
    %189 = vector.extract_strided_slice %187 {offsets = [0, 32], sizes = [2, 32], strides = [1, 1]} : vector<2x64xf32> to vector<2x32xf32>
    %190 = vector.extract_strided_slice %178 {offsets = [0, 64], sizes = [2, 32], strides = [1, 1]} : vector<2x96xf32> to vector<2x32xf32>
    %191 = vector.extract_strided_slice %179 {offsets = [0, 64], sizes = [2, 32], strides = [1, 1]} : vector<2x96xf32> to vector<2x32xf32>
    %192 = arith.addf %191, %7 : vector<2x32xf32>
    %193 = arith.mulf %188, %192 : vector<2x32xf32>
    %194 = arith.addf %190, %193 : vector<2x32xf32>
    %195 = math.tanh %194 : vector<2x32xf32>
    %cst_38 = arith.constant 1.000000e+00 : f32
    %196 = vector.broadcast %cst_38 : f32 to vector<2x32xf32>
    %197 = arith.subf %196, %189 : vector<2x32xf32>
    %198 = arith.mulf %197, %195 : vector<2x32xf32>
    %199 = arith.mulf %189, %148 : vector<2x32xf32>
    %200 = arith.addf %198, %199 : vector<2x32xf32>
    %cst_39 = arith.constant dense<0.000000e+00> : vector<2x96xf32>
    %201 = tpu.matmul %200, %2, %cst_39 {dimension_numbers = #tpu.dot_dimension_numbers<[1], [0], [0], [1], [0, 0, 1, 1], [], []>} : vector<2x32xf32>, vector<32x96xf32>, vector<2x96xf32> -> vector<2x96xf32>
    %202 = arith.addf %201, %10 : vector<2x96xf32>
    %cst_40 = arith.constant dense<0.000000e+00> : vector<2x96xf32>
    %203 = tpu.matmul %172, %3, %cst_40 {dimension_numbers = #tpu.dot_dimension_numbers<[1], [0], [0], [1], [0, 0, 1, 1], [], []>} : vector<2x32xf32>, vector<32x96xf32>, vector<2x96xf32> -> vector<2x96xf32>
    %204 = vector.extract_strided_slice %202 {offsets = [0, 0], sizes = [2, 64], strides = [1, 1]} : vector<2x96xf32> to vector<2x64xf32>
    %205 = vector.extract_strided_slice %203 {offsets = [0, 0], sizes = [2, 64], strides = [1, 1]} : vector<2x96xf32> to vector<2x64xf32>
    %206 = arith.addf %204, %205 : vector<2x64xf32>
    %207 = arith.negf %206 : vector<2x64xf32>
    %208 = math.exp %207 : vector<2x64xf32>
    %cst_41 = arith.constant 1.000000e+00 : f32
    %209 = vector.broadcast %cst_41 : f32 to vector<2x64xf32>
    %210 = arith.addf %209, %208 : vector<2x64xf32>
    %211 = arith.divf %209, %210 : vector<2x64xf32>
    %212 = vector.extract_strided_slice %211 {offsets = [0, 0], sizes = [2, 32], strides = [1, 1]} : vector<2x64xf32> to vector<2x32xf32>
    %213 = vector.extract_strided_slice %211 {offsets = [0, 32], sizes = [2, 32], strides = [1, 1]} : vector<2x64xf32> to vector<2x32xf32>
    %214 = vector.extract_strided_slice %202 {offsets = [0, 64], sizes = [2, 32], strides = [1, 1]} : vector<2x96xf32> to vector<2x32xf32>
    %215 = vector.extract_strided_slice %203 {offsets = [0, 64], sizes = [2, 32], strides = [1, 1]} : vector<2x96xf32> to vector<2x32xf32>
    %216 = arith.addf %215, %13 : vector<2x32xf32>
    %217 = arith.mulf %212, %216 : vector<2x32xf32>
    %218 = arith.addf %214, %217 : vector<2x32xf32>
    %219 = math.tanh %218 : vector<2x32xf32>
    %cst_42 = arith.constant 1.000000e+00 : f32
    %220 = vector.broadcast %cst_42 : f32 to vector<2x32xf32>
    %221 = arith.subf %220, %213 : vector<2x32xf32>
    %222 = arith.mulf %221, %219 : vector<2x32xf32>
    %223 = arith.mulf %213, %172 : vector<2x32xf32>
    %224 = arith.addf %222, %223 : vector<2x32xf32>
    %c4_i32 = arith.constant 4 : i32
    %225 = vector.broadcast %c4_i32 : i32 to vector<2x1xi32>
    %226 = arith.cmpi eq, %14, %225 : vector<2x1xi32>
    %227 = vector.shape_cast %226 : vector<2x1xi1> to vector<2x1xi1>
    %228 = vector.broadcast %227 : vector<2x1xi1> to vector<2x32xi1>
    %229 = arith.select %228, %224, %177 : vector<2x32xi1>, vector<2x32xf32>
    %230 = vector.extract_strided_slice %18 {offsets = [8, 0], sizes = [2, 96], strides = [1, 1]} : vector<16x96xf32> to vector<2x96xf32>
    %cst_43 = arith.constant dense<0.000000e+00> : vector<2x96xf32>
    %231 = tpu.matmul %200, %1, %cst_43 {dimension_numbers = #tpu.dot_dimension_numbers<[1], [0], [0], [1], [0, 0, 1, 1], [], []>} : vector<2x32xf32>, vector<32x96xf32>, vector<2x96xf32> -> vector<2x96xf32>
    %232 = vector.extract_strided_slice %230 {offsets = [0, 0], sizes = [2, 64], strides = [1, 1]} : vector<2x96xf32> to vector<2x64xf32>
    %233 = vector.extract_strided_slice %231 {offsets = [0, 0], sizes = [2, 64], strides = [1, 1]} : vector<2x96xf32> to vector<2x64xf32>
    %234 = arith.addf %232, %233 : vector<2x64xf32>
    %235 = arith.negf %234 : vector<2x64xf32>
    %236 = math.exp %235 : vector<2x64xf32>
    %cst_44 = arith.constant 1.000000e+00 : f32
    %237 = vector.broadcast %cst_44 : f32 to vector<2x64xf32>
    %238 = arith.addf %237, %236 : vector<2x64xf32>
    %239 = arith.divf %237, %238 : vector<2x64xf32>
    %240 = vector.extract_strided_slice %239 {offsets = [0, 0], sizes = [2, 32], strides = [1, 1]} : vector<2x64xf32> to vector<2x32xf32>
    %241 = vector.extract_strided_slice %239 {offsets = [0, 32], sizes = [2, 32], strides = [1, 1]} : vector<2x64xf32> to vector<2x32xf32>
    %242 = vector.extract_strided_slice %230 {offsets = [0, 64], sizes = [2, 32], strides = [1, 1]} : vector<2x96xf32> to vector<2x32xf32>
    %243 = vector.extract_strided_slice %231 {offsets = [0, 64], sizes = [2, 32], strides = [1, 1]} : vector<2x96xf32> to vector<2x32xf32>
    %244 = arith.addf %243, %7 : vector<2x32xf32>
    %245 = arith.mulf %240, %244 : vector<2x32xf32>
    %246 = arith.addf %242, %245 : vector<2x32xf32>
    %247 = math.tanh %246 : vector<2x32xf32>
    %cst_45 = arith.constant 1.000000e+00 : f32
    %248 = vector.broadcast %cst_45 : f32 to vector<2x32xf32>
    %249 = arith.subf %248, %241 : vector<2x32xf32>
    %250 = arith.mulf %249, %247 : vector<2x32xf32>
    %251 = arith.mulf %241, %200 : vector<2x32xf32>
    %252 = arith.addf %250, %251 : vector<2x32xf32>
    %cst_46 = arith.constant dense<0.000000e+00> : vector<2x96xf32>
    %253 = tpu.matmul %252, %2, %cst_46 {dimension_numbers = #tpu.dot_dimension_numbers<[1], [0], [0], [1], [0, 0, 1, 1], [], []>} : vector<2x32xf32>, vector<32x96xf32>, vector<2x96xf32> -> vector<2x96xf32>
    %254 = arith.addf %253, %10 : vector<2x96xf32>
    %cst_47 = arith.constant dense<0.000000e+00> : vector<2x96xf32>
    %255 = tpu.matmul %224, %3, %cst_47 {dimension_numbers = #tpu.dot_dimension_numbers<[1], [0], [0], [1], [0, 0, 1, 1], [], []>} : vector<2x32xf32>, vector<32x96xf32>, vector<2x96xf32> -> vector<2x96xf32>
    %256 = vector.extract_strided_slice %254 {offsets = [0, 0], sizes = [2, 64], strides = [1, 1]} : vector<2x96xf32> to vector<2x64xf32>
    %257 = vector.extract_strided_slice %255 {offsets = [0, 0], sizes = [2, 64], strides = [1, 1]} : vector<2x96xf32> to vector<2x64xf32>
    %258 = arith.addf %256, %257 : vector<2x64xf32>
    %259 = arith.negf %258 : vector<2x64xf32>
    %260 = math.exp %259 : vector<2x64xf32>
    %cst_48 = arith.constant 1.000000e+00 : f32
    %261 = vector.broadcast %cst_48 : f32 to vector<2x64xf32>
    %262 = arith.addf %261, %260 : vector<2x64xf32>
    %263 = arith.divf %261, %262 : vector<2x64xf32>
    %264 = vector.extract_strided_slice %263 {offsets = [0, 0], sizes = [2, 32], strides = [1, 1]} : vector<2x64xf32> to vector<2x32xf32>
    %265 = vector.extract_strided_slice %263 {offsets = [0, 32], sizes = [2, 32], strides = [1, 1]} : vector<2x64xf32> to vector<2x32xf32>
    %266 = vector.extract_strided_slice %254 {offsets = [0, 64], sizes = [2, 32], strides = [1, 1]} : vector<2x96xf32> to vector<2x32xf32>
    %267 = vector.extract_strided_slice %255 {offsets = [0, 64], sizes = [2, 32], strides = [1, 1]} : vector<2x96xf32> to vector<2x32xf32>
    %268 = arith.addf %267, %13 : vector<2x32xf32>
    %269 = arith.mulf %264, %268 : vector<2x32xf32>
    %270 = arith.addf %266, %269 : vector<2x32xf32>
    %271 = math.tanh %270 : vector<2x32xf32>
    %cst_49 = arith.constant 1.000000e+00 : f32
    %272 = vector.broadcast %cst_49 : f32 to vector<2x32xf32>
    %273 = arith.subf %272, %265 : vector<2x32xf32>
    %274 = arith.mulf %273, %271 : vector<2x32xf32>
    %275 = arith.mulf %265, %224 : vector<2x32xf32>
    %276 = arith.addf %274, %275 : vector<2x32xf32>
    %c5_i32 = arith.constant 5 : i32
    %277 = vector.broadcast %c5_i32 : i32 to vector<2x1xi32>
    %278 = arith.cmpi eq, %14, %277 : vector<2x1xi32>
    %279 = vector.shape_cast %278 : vector<2x1xi1> to vector<2x1xi1>
    %280 = vector.broadcast %279 : vector<2x1xi1> to vector<2x32xi1>
    %281 = arith.select %280, %276, %229 : vector<2x32xi1>, vector<2x32xf32>
    %282 = vector.extract_strided_slice %18 {offsets = [10, 0], sizes = [2, 96], strides = [1, 1]} : vector<16x96xf32> to vector<2x96xf32>
    %cst_50 = arith.constant dense<0.000000e+00> : vector<2x96xf32>
    %283 = tpu.matmul %252, %1, %cst_50 {dimension_numbers = #tpu.dot_dimension_numbers<[1], [0], [0], [1], [0, 0, 1, 1], [], []>} : vector<2x32xf32>, vector<32x96xf32>, vector<2x96xf32> -> vector<2x96xf32>
    %284 = vector.extract_strided_slice %282 {offsets = [0, 0], sizes = [2, 64], strides = [1, 1]} : vector<2x96xf32> to vector<2x64xf32>
    %285 = vector.extract_strided_slice %283 {offsets = [0, 0], sizes = [2, 64], strides = [1, 1]} : vector<2x96xf32> to vector<2x64xf32>
    %286 = arith.addf %284, %285 : vector<2x64xf32>
    %287 = arith.negf %286 : vector<2x64xf32>
    %288 = math.exp %287 : vector<2x64xf32>
    %cst_51 = arith.constant 1.000000e+00 : f32
    %289 = vector.broadcast %cst_51 : f32 to vector<2x64xf32>
    %290 = arith.addf %289, %288 : vector<2x64xf32>
    %291 = arith.divf %289, %290 : vector<2x64xf32>
    %292 = vector.extract_strided_slice %291 {offsets = [0, 0], sizes = [2, 32], strides = [1, 1]} : vector<2x64xf32> to vector<2x32xf32>
    %293 = vector.extract_strided_slice %291 {offsets = [0, 32], sizes = [2, 32], strides = [1, 1]} : vector<2x64xf32> to vector<2x32xf32>
    %294 = vector.extract_strided_slice %282 {offsets = [0, 64], sizes = [2, 32], strides = [1, 1]} : vector<2x96xf32> to vector<2x32xf32>
    %295 = vector.extract_strided_slice %283 {offsets = [0, 64], sizes = [2, 32], strides = [1, 1]} : vector<2x96xf32> to vector<2x32xf32>
    %296 = arith.addf %295, %7 : vector<2x32xf32>
    %297 = arith.mulf %292, %296 : vector<2x32xf32>
    %298 = arith.addf %294, %297 : vector<2x32xf32>
    %299 = math.tanh %298 : vector<2x32xf32>
    %cst_52 = arith.constant 1.000000e+00 : f32
    %300 = vector.broadcast %cst_52 : f32 to vector<2x32xf32>
    %301 = arith.subf %300, %293 : vector<2x32xf32>
    %302 = arith.mulf %301, %299 : vector<2x32xf32>
    %303 = arith.mulf %293, %252 : vector<2x32xf32>
    %304 = arith.addf %302, %303 : vector<2x32xf32>
    %cst_53 = arith.constant dense<0.000000e+00> : vector<2x96xf32>
    %305 = tpu.matmul %304, %2, %cst_53 {dimension_numbers = #tpu.dot_dimension_numbers<[1], [0], [0], [1], [0, 0, 1, 1], [], []>} : vector<2x32xf32>, vector<32x96xf32>, vector<2x96xf32> -> vector<2x96xf32>
    %306 = arith.addf %305, %10 : vector<2x96xf32>
    %cst_54 = arith.constant dense<0.000000e+00> : vector<2x96xf32>
    %307 = tpu.matmul %276, %3, %cst_54 {dimension_numbers = #tpu.dot_dimension_numbers<[1], [0], [0], [1], [0, 0, 1, 1], [], []>} : vector<2x32xf32>, vector<32x96xf32>, vector<2x96xf32> -> vector<2x96xf32>
    %308 = vector.extract_strided_slice %306 {offsets = [0, 0], sizes = [2, 64], strides = [1, 1]} : vector<2x96xf32> to vector<2x64xf32>
    %309 = vector.extract_strided_slice %307 {offsets = [0, 0], sizes = [2, 64], strides = [1, 1]} : vector<2x96xf32> to vector<2x64xf32>
    %310 = arith.addf %308, %309 : vector<2x64xf32>
    %311 = arith.negf %310 : vector<2x64xf32>
    %312 = math.exp %311 : vector<2x64xf32>
    %cst_55 = arith.constant 1.000000e+00 : f32
    %313 = vector.broadcast %cst_55 : f32 to vector<2x64xf32>
    %314 = arith.addf %313, %312 : vector<2x64xf32>
    %315 = arith.divf %313, %314 : vector<2x64xf32>
    %316 = vector.extract_strided_slice %315 {offsets = [0, 0], sizes = [2, 32], strides = [1, 1]} : vector<2x64xf32> to vector<2x32xf32>
    %317 = vector.extract_strided_slice %315 {offsets = [0, 32], sizes = [2, 32], strides = [1, 1]} : vector<2x64xf32> to vector<2x32xf32>
    %318 = vector.extract_strided_slice %306 {offsets = [0, 64], sizes = [2, 32], strides = [1, 1]} : vector<2x96xf32> to vector<2x32xf32>
    %319 = vector.extract_strided_slice %307 {offsets = [0, 64], sizes = [2, 32], strides = [1, 1]} : vector<2x96xf32> to vector<2x32xf32>
    %320 = arith.addf %319, %13 : vector<2x32xf32>
    %321 = arith.mulf %316, %320 : vector<2x32xf32>
    %322 = arith.addf %318, %321 : vector<2x32xf32>
    %323 = math.tanh %322 : vector<2x32xf32>
    %cst_56 = arith.constant 1.000000e+00 : f32
    %324 = vector.broadcast %cst_56 : f32 to vector<2x32xf32>
    %325 = arith.subf %324, %317 : vector<2x32xf32>
    %326 = arith.mulf %325, %323 : vector<2x32xf32>
    %327 = arith.mulf %317, %276 : vector<2x32xf32>
    %328 = arith.addf %326, %327 : vector<2x32xf32>
    %c6_i32 = arith.constant 6 : i32
    %329 = vector.broadcast %c6_i32 : i32 to vector<2x1xi32>
    %330 = arith.cmpi eq, %14, %329 : vector<2x1xi32>
    %331 = vector.shape_cast %330 : vector<2x1xi1> to vector<2x1xi1>
    %332 = vector.broadcast %331 : vector<2x1xi1> to vector<2x32xi1>
    %333 = arith.select %332, %328, %281 : vector<2x32xi1>, vector<2x32xf32>
    %334 = vector.extract_strided_slice %18 {offsets = [12, 0], sizes = [2, 96], strides = [1, 1]} : vector<16x96xf32> to vector<2x96xf32>
    %cst_57 = arith.constant dense<0.000000e+00> : vector<2x96xf32>
    %335 = tpu.matmul %304, %1, %cst_57 {dimension_numbers = #tpu.dot_dimension_numbers<[1], [0], [0], [1], [0, 0, 1, 1], [], []>} : vector<2x32xf32>, vector<32x96xf32>, vector<2x96xf32> -> vector<2x96xf32>
    %336 = vector.extract_strided_slice %334 {offsets = [0, 0], sizes = [2, 64], strides = [1, 1]} : vector<2x96xf32> to vector<2x64xf32>
    %337 = vector.extract_strided_slice %335 {offsets = [0, 0], sizes = [2, 64], strides = [1, 1]} : vector<2x96xf32> to vector<2x64xf32>
    %338 = arith.addf %336, %337 : vector<2x64xf32>
    %339 = arith.negf %338 : vector<2x64xf32>
    %340 = math.exp %339 : vector<2x64xf32>
    %cst_58 = arith.constant 1.000000e+00 : f32
    %341 = vector.broadcast %cst_58 : f32 to vector<2x64xf32>
    %342 = arith.addf %341, %340 : vector<2x64xf32>
    %343 = arith.divf %341, %342 : vector<2x64xf32>
    %344 = vector.extract_strided_slice %343 {offsets = [0, 0], sizes = [2, 32], strides = [1, 1]} : vector<2x64xf32> to vector<2x32xf32>
    %345 = vector.extract_strided_slice %343 {offsets = [0, 32], sizes = [2, 32], strides = [1, 1]} : vector<2x64xf32> to vector<2x32xf32>
    %346 = vector.extract_strided_slice %334 {offsets = [0, 64], sizes = [2, 32], strides = [1, 1]} : vector<2x96xf32> to vector<2x32xf32>
    %347 = vector.extract_strided_slice %335 {offsets = [0, 64], sizes = [2, 32], strides = [1, 1]} : vector<2x96xf32> to vector<2x32xf32>
    %348 = arith.addf %347, %7 : vector<2x32xf32>
    %349 = arith.mulf %344, %348 : vector<2x32xf32>
    %350 = arith.addf %346, %349 : vector<2x32xf32>
    %351 = math.tanh %350 : vector<2x32xf32>
    %cst_59 = arith.constant 1.000000e+00 : f32
    %352 = vector.broadcast %cst_59 : f32 to vector<2x32xf32>
    %353 = arith.subf %352, %345 : vector<2x32xf32>
    %354 = arith.mulf %353, %351 : vector<2x32xf32>
    %355 = arith.mulf %345, %304 : vector<2x32xf32>
    %356 = arith.addf %354, %355 : vector<2x32xf32>
    %cst_60 = arith.constant dense<0.000000e+00> : vector<2x96xf32>
    %357 = tpu.matmul %356, %2, %cst_60 {dimension_numbers = #tpu.dot_dimension_numbers<[1], [0], [0], [1], [0, 0, 1, 1], [], []>} : vector<2x32xf32>, vector<32x96xf32>, vector<2x96xf32> -> vector<2x96xf32>
    %358 = arith.addf %357, %10 : vector<2x96xf32>
    %cst_61 = arith.constant dense<0.000000e+00> : vector<2x96xf32>
    %359 = tpu.matmul %328, %3, %cst_61 {dimension_numbers = #tpu.dot_dimension_numbers<[1], [0], [0], [1], [0, 0, 1, 1], [], []>} : vector<2x32xf32>, vector<32x96xf32>, vector<2x96xf32> -> vector<2x96xf32>
    %360 = vector.extract_strided_slice %358 {offsets = [0, 0], sizes = [2, 64], strides = [1, 1]} : vector<2x96xf32> to vector<2x64xf32>
    %361 = vector.extract_strided_slice %359 {offsets = [0, 0], sizes = [2, 64], strides = [1, 1]} : vector<2x96xf32> to vector<2x64xf32>
    %362 = arith.addf %360, %361 : vector<2x64xf32>
    %363 = arith.negf %362 : vector<2x64xf32>
    %364 = math.exp %363 : vector<2x64xf32>
    %cst_62 = arith.constant 1.000000e+00 : f32
    %365 = vector.broadcast %cst_62 : f32 to vector<2x64xf32>
    %366 = arith.addf %365, %364 : vector<2x64xf32>
    %367 = arith.divf %365, %366 : vector<2x64xf32>
    %368 = vector.extract_strided_slice %367 {offsets = [0, 0], sizes = [2, 32], strides = [1, 1]} : vector<2x64xf32> to vector<2x32xf32>
    %369 = vector.extract_strided_slice %367 {offsets = [0, 32], sizes = [2, 32], strides = [1, 1]} : vector<2x64xf32> to vector<2x32xf32>
    %370 = vector.extract_strided_slice %358 {offsets = [0, 64], sizes = [2, 32], strides = [1, 1]} : vector<2x96xf32> to vector<2x32xf32>
    %371 = vector.extract_strided_slice %359 {offsets = [0, 64], sizes = [2, 32], strides = [1, 1]} : vector<2x96xf32> to vector<2x32xf32>
    %372 = arith.addf %371, %13 : vector<2x32xf32>
    %373 = arith.mulf %368, %372 : vector<2x32xf32>
    %374 = arith.addf %370, %373 : vector<2x32xf32>
    %375 = math.tanh %374 : vector<2x32xf32>
    %cst_63 = arith.constant 1.000000e+00 : f32
    %376 = vector.broadcast %cst_63 : f32 to vector<2x32xf32>
    %377 = arith.subf %376, %369 : vector<2x32xf32>
    %378 = arith.mulf %377, %375 : vector<2x32xf32>
    %379 = arith.mulf %369, %328 : vector<2x32xf32>
    %380 = arith.addf %378, %379 : vector<2x32xf32>
    %c7_i32 = arith.constant 7 : i32
    %381 = vector.broadcast %c7_i32 : i32 to vector<2x1xi32>
    %382 = arith.cmpi eq, %14, %381 : vector<2x1xi32>
    %383 = vector.shape_cast %382 : vector<2x1xi1> to vector<2x1xi1>
    %384 = vector.broadcast %383 : vector<2x1xi1> to vector<2x32xi1>
    %385 = arith.select %384, %380, %333 : vector<2x32xi1>, vector<2x32xf32>
    %386 = vector.extract_strided_slice %18 {offsets = [14, 0], sizes = [2, 96], strides = [1, 1]} : vector<16x96xf32> to vector<2x96xf32>
    %cst_64 = arith.constant dense<0.000000e+00> : vector<2x96xf32>
    %387 = tpu.matmul %356, %1, %cst_64 {dimension_numbers = #tpu.dot_dimension_numbers<[1], [0], [0], [1], [0, 0, 1, 1], [], []>} : vector<2x32xf32>, vector<32x96xf32>, vector<2x96xf32> -> vector<2x96xf32>
    %388 = vector.extract_strided_slice %386 {offsets = [0, 0], sizes = [2, 64], strides = [1, 1]} : vector<2x96xf32> to vector<2x64xf32>
    %389 = vector.extract_strided_slice %387 {offsets = [0, 0], sizes = [2, 64], strides = [1, 1]} : vector<2x96xf32> to vector<2x64xf32>
    %390 = arith.addf %388, %389 : vector<2x64xf32>
    %391 = arith.negf %390 : vector<2x64xf32>
    %392 = math.exp %391 : vector<2x64xf32>
    %cst_65 = arith.constant 1.000000e+00 : f32
    %393 = vector.broadcast %cst_65 : f32 to vector<2x64xf32>
    %394 = arith.addf %393, %392 : vector<2x64xf32>
    %395 = arith.divf %393, %394 : vector<2x64xf32>
    %396 = vector.extract_strided_slice %395 {offsets = [0, 0], sizes = [2, 32], strides = [1, 1]} : vector<2x64xf32> to vector<2x32xf32>
    %397 = vector.extract_strided_slice %395 {offsets = [0, 32], sizes = [2, 32], strides = [1, 1]} : vector<2x64xf32> to vector<2x32xf32>
    %398 = vector.extract_strided_slice %386 {offsets = [0, 64], sizes = [2, 32], strides = [1, 1]} : vector<2x96xf32> to vector<2x32xf32>
    %399 = vector.extract_strided_slice %387 {offsets = [0, 64], sizes = [2, 32], strides = [1, 1]} : vector<2x96xf32> to vector<2x32xf32>
    %400 = arith.addf %399, %7 : vector<2x32xf32>
    %401 = arith.mulf %396, %400 : vector<2x32xf32>
    %402 = arith.addf %398, %401 : vector<2x32xf32>
    %403 = math.tanh %402 : vector<2x32xf32>
    %cst_66 = arith.constant 1.000000e+00 : f32
    %404 = vector.broadcast %cst_66 : f32 to vector<2x32xf32>
    %405 = arith.subf %404, %397 : vector<2x32xf32>
    %406 = arith.mulf %405, %403 : vector<2x32xf32>
    %407 = arith.mulf %397, %356 : vector<2x32xf32>
    %408 = arith.addf %406, %407 : vector<2x32xf32>
    %cst_67 = arith.constant dense<0.000000e+00> : vector<2x96xf32>
    %409 = tpu.matmul %408, %2, %cst_67 {dimension_numbers = #tpu.dot_dimension_numbers<[1], [0], [0], [1], [0, 0, 1, 1], [], []>} : vector<2x32xf32>, vector<32x96xf32>, vector<2x96xf32> -> vector<2x96xf32>
    %410 = arith.addf %409, %10 : vector<2x96xf32>
    %cst_68 = arith.constant dense<0.000000e+00> : vector<2x96xf32>
    %411 = tpu.matmul %380, %3, %cst_68 {dimension_numbers = #tpu.dot_dimension_numbers<[1], [0], [0], [1], [0, 0, 1, 1], [], []>} : vector<2x32xf32>, vector<32x96xf32>, vector<2x96xf32> -> vector<2x96xf32>
    %412 = vector.extract_strided_slice %410 {offsets = [0, 0], sizes = [2, 64], strides = [1, 1]} : vector<2x96xf32> to vector<2x64xf32>
    %413 = vector.extract_strided_slice %411 {offsets = [0, 0], sizes = [2, 64], strides = [1, 1]} : vector<2x96xf32> to vector<2x64xf32>
    %414 = arith.addf %412, %413 : vector<2x64xf32>
    %415 = arith.negf %414 : vector<2x64xf32>
    %416 = math.exp %415 : vector<2x64xf32>
    %cst_69 = arith.constant 1.000000e+00 : f32
    %417 = vector.broadcast %cst_69 : f32 to vector<2x64xf32>
    %418 = arith.addf %417, %416 : vector<2x64xf32>
    %419 = arith.divf %417, %418 : vector<2x64xf32>
    %420 = vector.extract_strided_slice %419 {offsets = [0, 0], sizes = [2, 32], strides = [1, 1]} : vector<2x64xf32> to vector<2x32xf32>
    %421 = vector.extract_strided_slice %419 {offsets = [0, 32], sizes = [2, 32], strides = [1, 1]} : vector<2x64xf32> to vector<2x32xf32>
    %422 = vector.extract_strided_slice %410 {offsets = [0, 64], sizes = [2, 32], strides = [1, 1]} : vector<2x96xf32> to vector<2x32xf32>
    %423 = vector.extract_strided_slice %411 {offsets = [0, 64], sizes = [2, 32], strides = [1, 1]} : vector<2x96xf32> to vector<2x32xf32>
    %424 = arith.addf %423, %13 : vector<2x32xf32>
    %425 = arith.mulf %420, %424 : vector<2x32xf32>
    %426 = arith.addf %422, %425 : vector<2x32xf32>
    %427 = math.tanh %426 : vector<2x32xf32>
    %cst_70 = arith.constant 1.000000e+00 : f32
    %428 = vector.broadcast %cst_70 : f32 to vector<2x32xf32>
    %429 = arith.subf %428, %421 : vector<2x32xf32>
    %430 = arith.mulf %429, %427 : vector<2x32xf32>
    %431 = arith.mulf %421, %380 : vector<2x32xf32>
    %432 = arith.addf %430, %431 : vector<2x32xf32>
    %c8_i32 = arith.constant 8 : i32
    %433 = vector.broadcast %c8_i32 : i32 to vector<2x1xi32>
    %434 = arith.cmpi eq, %14, %433 : vector<2x1xi32>
    %435 = vector.shape_cast %434 : vector<2x1xi1> to vector<2x1xi1>
    %436 = vector.broadcast %435 : vector<2x1xi1> to vector<2x32xi1>
    %437 = arith.select %436, %432, %385 : vector<2x32xi1>, vector<2x32xf32>
    %c0_71 = arith.constant 0 : index
    %c0_72 = arith.constant 0 : index
    %438 = vector.load %arg4[%c0_71, %c0_72] : memref<74x32xf32, #tpu.memory_space<vmem>>, vector<32x32xf32>
    %c32 = arith.constant 32 : index
    %c0_73 = arith.constant 0 : index
    %439 = vector.load %arg4[%c32, %c0_73] : memref<74x32xf32, #tpu.memory_space<vmem>>, vector<32x32xf32>
    %c64 = arith.constant 64 : index
    %c0_74 = arith.constant 0 : index
    %440 = vector.load %arg4[%c64, %c0_74] : memref<74x32xf32, #tpu.memory_space<vmem>>, vector<8x32xf32>
    %c72 = arith.constant 72 : index
    %c0_75 = arith.constant 0 : index
    %441 = vector.load %arg4[%c72, %c0_75] : memref<74x32xf32, #tpu.memory_space<vmem>>, vector<1x32xf32>
    %c73 = arith.constant 73 : index
    %c0_76 = arith.constant 0 : index
    %442 = vector.load %arg4[%c73, %c0_76] : memref<74x32xf32, #tpu.memory_space<vmem>>, vector<1x32xf32>
    %cst_77 = arith.constant dense<0.000000e+00> : vector<2x32xf32>
    %443 = tpu.matmul %437, %438, %cst_77 {dimension_numbers = #tpu.dot_dimension_numbers<[1], [0], [0], [1], [0, 0, 1, 1], [], []>} : vector<2x32xf32>, vector<32x32xf32>, vector<2x32xf32> -> vector<2x32xf32>
    %c0_78 = arith.constant 0 : index
    %c0_79 = arith.constant 0 : index
    %444 = vector.load %arg2[%c0_78, %c0_79] : memref<2x8xf32, #tpu.memory_space<vmem>>, vector<2x8xf32>
    %cst_80 = arith.constant dense<0.000000e+00> : vector<2x32xf32>
    %445 = tpu.matmul %444, %440, %cst_80 {dimension_numbers = #tpu.dot_dimension_numbers<[1], [0], [0], [1], [0, 0, 1, 1], [], []>} : vector<2x8xf32>, vector<8x32xf32>, vector<2x32xf32> -> vector<2x32xf32>
    %446 = arith.addf %443, %445 : vector<2x32xf32>
    %447 = vector.broadcast %441 : vector<1x32xf32> to vector<2x32xf32>
    %448 = arith.addf %446, %447 : vector<2x32xf32>
    %cst_81 = arith.constant 0.000000e+00 : f32
    %449 = vector.broadcast %cst_81 : f32 to vector<2x32xf32>
    %450 = arith.maximumf %448, %449 : vector<2x32xf32>
    %cst_82 = arith.constant dense<0.000000e+00> : vector<2x32xf32>
    %451 = tpu.matmul %450, %439, %cst_82 {dimension_numbers = #tpu.dot_dimension_numbers<[1], [0], [0], [1], [0, 0, 1, 1], [], []>} : vector<2x32xf32>, vector<32x32xf32>, vector<2x32xf32> -> vector<2x32xf32>
    %452 = vector.broadcast %442 : vector<1x32xf32> to vector<2x32xf32>
    %453 = arith.addf %451, %452 : vector<2x32xf32>
    %c0_83 = arith.constant 0 : index
    %c0_84 = arith.constant 0 : index
    %454 = vector.load %arg5[%c0_83, %c0_84] : memref<2x32xf32, #tpu.memory_space<vmem>>, vector<2x32xf32>
    tpu.vector_store %arg5[%c0_83, %c0_84], %453 {strides = array<i32>} : memref<2x32xf32, #tpu.memory_space<vmem>>, vector<2x32xf32>,
    return
  }
}

</mosaic_0001>

<bundles_post_ra>
// kernel: tpu_custom_call.1
= control target key start
LH: loop header
LB: loop body
LE: loop exit
PB: predicated region body
PF: predicated region fallthrough
CT: control target
= control target key end

     0   :  { %vm59_vm0 = vcmask 195584   ;;  %v3475_v3 = vmov 0.0|0.0   ;;  %vm3476_vm1 = vmmov 0   ;;  %v3477_v11 = vmov 0.0   ;;  %s4005_s0 = inlined_call_operand.vmem [shape: s32[2,1], index: 0, kind: input, shape index: {}]   ;;  %s4006_s1 = inlined_call_operand.vmem [shape: f32[16,24], index: 1, kind: input, shape index: {}]   ;;  %s4007_s2 = inlined_call_operand.vmem [shape: f32[2,8], index: 2, kind: input, shape index: {}]   ;;  %s4008_s3 = inlined_call_operand.vmem [shape: f32[124,96], index: 3, kind: input, shape index: {}]   ;;  %s4009_s4 = inlined_call_operand.vmem [shape: f32[74,32], index: 4, kind: input, shape index: {}]   ;;  %s4010_s5 = inlined_call_operand.hbm [shape: f32[2,32], index: 5, kind: output, shape index: {}]  }
   0x1   :  { %v21_v0 = vld [vmem:[%s4008_s3] sm:$0xff]  ;;  %v22_v1 = vld [vmem:[%s4008_s3 + $0x8] sm:$0xff]  ;;  %v24_v2 = vld [vmem:[%s4008_s3 + $0x18] sm:$0xff]  ;;  %3189 = vmatprep.subr.bf16.mxu1 %v3475_v3  ;;  %2902 = vmatprep.mubr.msk.f32.mxu1 %vm3476_vm1, %v3477_v11 }
   0x2   :  { %v3185_v4 = vpack.c.bf16 %v22_v1, %v21_v0  ;;  %v25_v5 = vld [vmem:[%s4008_s3 + $0x20] sm:$0xff]  ;;  %v26_v6 = vld [vmem:[%s4008_s3 + $0x28] sm:$0xff]  ;;  %v23_v8 = vld [vmem:[%s4008_s3 + $0x10] sm:$0xff] }
   0x3   :  { %v3528_v7 = vpack.c.bf16 %v25_v5, %v24_v2  ;;  %v27_v9 = vld [vmem:[%s4008_s3 + $0x30] sm:$0xff]  ;;  %v53_v10 = vld [vmem:[%s4006_s1] sm:$0xff]  ;;  %v2699_v12 = vld [vmem:[%s4008_s3 + $0x79] ss:$0 sm:$0xff] }
   0x4   :  { %3186 = vmatprep.subr.bf16.mxu0 %v3185_v4  ;;  %2891 = vmatprep.mubr.msk.f32.mxu0 %vm59_vm0, %v53_v10 }
   0x5   :  { %10 = vsyncpa [#allocation3], 0  ;;  %3191 = vmatpush3.bf16.msra.mxu1 %v3528_v7  ;;  %3188 = vmatpush3.bf16.msra.mxu0 %v3185_v4  ;;  %v3546_v13 = vpack.c.bf16 %v27_v9, %v26_v6  ;;  %v54_v14 = vld [vmem:[%s4006_s1 + $0x8] sm:$0xff]  ;;  %s3478_s13 = smov 64   ;;  %v2702_v16 = vld [vmem:[%s4008_s3 + $0x78] ss:$0 sm:$0xff] }
   0x6   :  { %3192 = vmatprep.subr.bf16.mxu1 %v3475_v3  ;;  %2889 = vmatprep.subr.mxu0 %v23_v8  ;;  %v32_v33 = vld [vmem:[%s4008_s3 + $0x58] sm:$0xff]  ;;  %v33_v34 = vld [vmem:[%s4008_s3 + $0x60] sm:$0xff]  ;;  %v34_v35 = vld [vmem:[%s4008_s3 + $0x68] sm:$0xff]  ;;  %s3479_s6 = smov 96   ;;  %vm141_vm2 = vcmask 261120   ;;  %vm2451_vm11 = vcmask 64512  }
   0x7   :  { %223 = vrot.lane.b32.xlu0 %v2699_v12, %s3478_s13  ;;  %v3585_v36 = vpack.c.bf16 %v33_v34, %v32_v33  ;;  %v35_v37 = vld [vmem:[%s4008_s3 + $0x70] sm:$0xff]  ;;  %v28_v38 = vld [vmem:[%s4008_s3 + $0x38] sm:$0xff]  ;;  %v29_v39 = vld [vmem:[%s4008_s3 + $0x40] sm:$0xff]  ;;  %s3481_s10 = smov [#allocation2]  }
   0x8   :  { %v3596_v40 = vpack.c.bf16 %v29_v39, %v28_v38  ;;  %v30_v41 = vld [vmem:[%s4008_s3 + $0x48] sm:$0xff]  ;;  %v31_v42 = vld [vmem:[%s4008_s3 + $0x50] sm:$0xff]  ;;  %v3605_v43 = vpack.c.bf16 %v35_v37, %v34_v35  ;;  %v2701_v48 = vld [vmem:[%s4008_s3 + $0x7b] ss:$0 sm:$0xff]  ;;  %s2691_s11 = sshll.u32 %s3481_s10, 4  ;;  %s2692_s11 = int_to_ptr.vmem [resolvable:$true] %s2691_s11 }
   0x9   :  { %3194 = vmatpush3.bf16.msra.mxu1 %v3546_v13  ;;  %2890 = vmatpush3.msra.mxu0 %v23_v8  ;;  %v3609_v44 = vpack.c.bf16 %v31_v42, %v30_v41  ;;  %v3653_v57 = vld [vmem:[%s4008_s3 + $0x7a] ss:$0 sm:$0xff]  ;;  %s3451_s12 = scalar_lea.vmem %s2692_s11, 32  ;;  %p3456_p1 = scmp.lt.s32.totalorder %s2692_s11, %s2692_s11 }
   0xa   :  { %2892 = vmatmul.mubr.msk.f32.vlgmr.msra.gmra.mrb[0].mxu0 %vm59_vm0, %v54_v14  ;;  %3201 = vmatprep.subr.bf16.mxu1 %v3475_v3  ;;  %p3452_p0 = scmp.ne.s32.totalorder %s2692_s11, %s3451_s12  ;;  %p3457_p2 = scmp.lt.s32.totalorder %s3451_s12, %s3451_s12 }
   0xb   :  { %3195 = vmatprep.subr.bf16.mxu0 %v3475_v3  ;;  %2913 = vmatprep.mubr.msk.f32.mxu0 %vm3476_vm1, %v3477_v11 }
   0xc   :  { %2903 = vmatmul.mubr.f32.vlgmr.msra.gmra.mrb[0].mxu1 %v3477_v11  ;;  %3197 = vmatpush3.bf16.msra.mxu0 %v3596_v40  ;;  %p3458_p3 = por %p3457_p2, %p3456_p1 }
   0xd   :  { %2924 = vmatprep.mubr.msk.f32.mxu1 %vm3476_vm1, %v3477_v11  ;;  %3203 = vmatpush3.bf16.msra.mxu1 %v3585_v36 }
   0xe   :  { %3204 = vmatprep.subr.bf16.mxu1 %v3475_v3  ;;  %3198 = vmatprep.subr.bf16.mxu0 %v3475_v3  ;;  %p3459_p4 = pnand %p3458_p3, %p3452_p0 }
  0x10   :  { %3200 = vmatpush3.bf16.msra.mxu0 %v3609_v44 }
  0x11   :  { %3206 = vmatpush3.bf16.msra.mxu1 %v3605_v43  ;;  %3207 = vmatprep.subr.bf16.mxu0 %v3475_v3 }
  0x12   :  { %3213 = vmatprep.subr.bf16.mxu1 %v3475_v3 }
  0x14   :  { %2925 = vmatmul.mubr.f32.vlgmr.msra.gmra.mrb[2].mxu1 %v3477_v11 }
  0x15   :  { %3215 = vmatpush3.bf16.msra.mxu1 %v3596_v40  ;;  %2946 = vmatprep.mubr.msk.f32.mxu1 %vm3476_vm1, %v3477_v11 }
  0x16   :  { %3216 = vmatprep.subr.bf16.mxu1 %v3475_v3 }
  0x19   :  { %3218 = vmatpush3.bf16.msra.mxu1 %v3609_v44 }
  0x1a   :  { %3225 = vmatprep.subr.bf16.mxu1 %v3475_v3 }
  0x79   :  { %v3565_v17 = vpop.permute.xlu0 %223 }
  0xdd   :  { %v2893_v15 = vpop.f32.mrb[0].mxu0 }
  0xde   :  { %v3567_v18 = vadd.f32 %v2893_v15, %v2702_v16  ;;  %v132_v19 = vpop.f32.mrb[1].mxu0 }
  0xdf   :  { %v211_v20 = vpop.f32.mrb[0].mxu1  ;;  %v3571_v23 = vadd.f32 %v2702_v16, %v132_v19 }
  0xe0   :  { %v226_v21 = vadd.f32 %v3565_v17, %v211_v20  ;;  %v2904_v22 = vpop.f32.mrb[1].mxu1 }
  0xe1   :  { %v215_v24 = vadd.f32 %v211_v20, %v3571_v23 }
  0xe2   :  { %228 = vrot.lane.b32.xlu0 %v226_v21, %s3478_s13 }
  0xe3   :  { %v2705_v25 = vmul.f32 -1.442695, %v215_v24 }
  0xe5   :  { %3354 = vpow2.f32 %v2705_v25 }
  0xe7   :  { %v387_v52 = vpop.f32.mrb[2].mxu1 }
  0xe8   :  { %v2926_v53 = vpop.f32.mrb[3].mxu1 }
  0xef   :  { %v3355_v26 = vpop.eup %3354 }
  0xf0   :  { %v219_v27 = vadd.f32 1.0, %v3355_v26 }
  0xf2   :  { %3356 = vrcp.f32 %v219_v27 }
  0xfc   :  { %v3357_v28 = vpop.eup %3356 }
  0xfd   :  { %v238_v46 = vsub.f32 1.0, %v3357_v28  ;;  %v244_v49 = vmul.f32 0.0, %v3357_v28 }
 0x154   :  { %v229_v29 = vpop.permute.xlu0 %228 }
 0x155   :  { %v231_v30 = vmul.f32 %v3357_v28, %v229_v29 }
 0x157   :  { %233 = vrot.lane.b32.xlu1 %v231_v30, %s3478_s13 }
 0x1c9   :  { %v234_v31 = vpop.permute.xlu1 %233 }
 0x1ca   :  { %v236_v32 = vadd.f32 %v234_v31, %v3571_v23 }
 0x1cc   :  { %3358 = vtanh.f32 %v236_v32 }
 0x1d6   :  { %v3359_v45 = vpop.eup %3358 }
 0x1d7   :  { %240 = vrot.lane.b32.xlu1 %v3359_v45, %s3479_s6 }
 0x1db   :  { %399 = vrot.lane.b32.xlu1 %v2701_v48, %s3478_s13 }
 0x249   :  { %v241_v47 = vpop.permute.xlu1 %240 }
 0x24a   :  { %v243_v50 = vmul.f32 %v241_v47, %v238_v46 }
 0x24c   :  { %v3628_v51 = vadd.f32 %v244_v49, %v243_v50 }
 0x24d   :  { %v3632_v54 = vpop.permute.xlu1 %399 }
 0x24e   :  { %247 = vrot.lane.b32.xlu0 %v3628_v51, %s3479_s6  ;;  %v402_v55 = vadd.f32 %v3632_v54, %v387_v52  ;;  %v528_v34 = vrot.slane %v3628_v51, 6 }
 0x250   :  { %404 = vrot.lane.b32.xlu1 %v402_v55, %s3478_s13 }
 0x2c0   :  { %v248_v56 = vpop.permute.xlu0 %247 }
 0x2c1   :  { %2914 = vmatmul.mubr.msk.f32.vlgmr.msra.gmra.mrb[2].mxu0 %vm141_vm2, %v248_v56 }
 0x2c2   :  { %3209 = vmatpush3.bf16.msra.mxu0 %v3528_v7  ;;  %2935 = vmatprep.mubr.msk.f32.mxu0 %vm3476_vm1, %v3477_v11  ;;  %v405_v6 = vpop.permute.xlu1 %404 }
 0x2c3   :  { %3210 = vmatprep.subr.bf16.mxu0 %v3475_v3 }
 0x2c6   :  { %3212 = vmatpush3.bf16.msra.mxu0 %v3546_v13 }
 0x2c7   :  { %3219 = vmatprep.subr.bf16.mxu0 %v3475_v3 }
 0x2c9   :  { %2936 = vmatmul.mubr.msk.f32.vlgmr.msra.gmra.mrb[4].mxu0 %vm141_vm2, %v248_v56 }
 0x2ca   :  { %3221 = vmatpush3.bf16.msra.mxu0 %v3585_v36  ;;  %2957 = vmatprep.mubr.msk.f32.mxu0 %vm3476_vm1, %v3477_v11 }
 0x2cb   :  { %3222 = vmatprep.subr.bf16.mxu0 %v3475_v3 }
 0x2ce   :  { %3224 = vmatpush3.bf16.msra.mxu0 %v3605_v43 }
 0x2cf   :  { %3231 = vmatprep.subr.bf16.mxu0 %v3475_v3 }
 0x394   :  { %v317_v58 = vpop.f32.mrb[2].mxu0 }
 0x395   :  { %v318_v59 = vadd.f32 %v3653_v57, %v317_v58  ;;  %v2915_v60 = vpop.f32.mrb[3].mxu0 }
 0x397   :  { %v391_v61 = vadd.f32 %v387_v52, %v318_v59 }
 0x399   :  { %v2707_v62 = vmul.f32 -1.442695, %v391_v61 }
 0x39b   :  { %3360 = vpow2.f32 %v2707_v62 }
 0x39c   :  { %v495_v63 = vpop.f32.mrb[4].mxu0 }
 0x39d   :  { %v509_v0 = vadd.f32 %v495_v63, %v3565_v17  ;;  %v2937_v1 = vpop.f32.mrb[5].mxu0  ;;  %v500_v10 = vrot.slane %v495_v63, 6 }
 0x39f   :  { %v511_v2 = vrot.slane %v509_v0, 6  ;;  %v502_v12 = vadd.f32 %v500_v10, %v3571_v23 }
 0x3a1   :  { %512 = vrot.lane.b32.xlu0 %v511_v2, %s3478_s13  ;;  %v2709_v14 = vmul.f32 -1.442695, %v502_v12 }
 0x3a5   :  { %v3361_v4 = vpop.eup %3360 }
 0x3a6   :  { %v395_v5 = vadd.f32 1.0, %v3361_v4 }
 0x3a8   :  { %3362 = vrcp.f32 %v395_v5 }
 0x3a9   :  { %3364 = vpow2.f32 %v2709_v14 }
 0x3b2   :  { %v3363_v8 = vpop.eup %3362 }
 0x3b3   :  { %v407_v9 = vmul.f32 %v3363_v8, %v405_v6  ;;  %v3365_v15 = vpop.eup %3364  ;;  %v414_v29 = vsub.f32 1.0, %v3363_v8  ;;  %v420_v31 = vmul.f32 0.0, %v3363_v8 }
 0x3b4   :  { %v506_v16 = vadd.f32 1.0, %v3365_v15 }
 0x3b5   :  { %409 = vrot.lane.b32.xlu1 %v407_v9, %s3478_s13 }
 0x3b6   :  { %3366 = vrcp.f32 %v506_v16 }
 0x3c0   :  { %v3367_v19 = vpop.eup %3366 }
 0x3c1   :  { %v522_v35 = vsub.f32 1.0, %v3367_v19  ;;  %v530_v39 = vmul.f32 %v3367_v19, %v528_v34 }
 0x413   :  { %v513_v20 = vpop.permute.xlu0 %512 }
 0x414   :  { %v515_v21 = vmul.f32 %v3367_v19, %v513_v20 }
 0x416   :  { %517 = vrot.lane.b32.xlu0 %v515_v21, %s3478_s13 }
 0x427   :  { %v410_v22 = vpop.permute.xlu1 %409 }
 0x428   :  { %v412_v24 = vadd.f32 %v410_v22, %v318_v59 }
 0x42a   :  { %3368 = vtanh.f32 %v412_v24 }
 0x434   :  { %v3369_v25 = vpop.eup %3368 }
 0x435   :  { %416 = vrot.lane.b32.xlu1 %v3369_v25, %s3479_s6 }
 0x488   :  { %v518_v26 = vpop.permute.xlu0 %517 }
 0x489   :  { %v520_v27 = vadd.f32 %v518_v26, %v3571_v23 }
 0x48b   :  { %3370 = vtanh.f32 %v520_v27 }
 0x495   :  { %v3371_v28 = vpop.eup %3370 }
 0x496   :  { %524 = vrot.lane.b32.xlu0 %v3371_v28, %s3479_s6 }
 0x4a7   :  { %v417_v30 = vpop.permute.xlu1 %416 }
 0x4a8   :  { %v419_v32 = vmul.f32 %v417_v30, %v414_v29 }
 0x4aa   :  { %v3664_v33 = vadd.f32 %v420_v31, %v419_v32 }
 0x4ac   :  { %609 = vrot.lane.b32.xlu1 %v3664_v33, %s3479_s6 }
 0x508   :  { %v525_v37 = vpop.permute.xlu0 %524 }
 0x509   :  { %v527_v38 = vmul.f32 %v525_v37, %v522_v35 }
 0x50b   :  { %v3669_v41 = vadd.f32 %v530_v39, %v527_v38 }
 0x50d   :  { %v533_v42 = vrot.slane %v3669_v41, 2  ;;  %v816_v28 = vrot.slane %v3669_v41, 6 }
 0x50f   :  { %534 = vrot.lane.b32.xlu0 %v533_v42, %s3479_s6 }
 0x51e   :  { %v610_v45 = vpop.permute.xlu1 %609 }
 0x51f   :  { %2958 = vmatmul.mubr.msk.f32.vlgmr.msra.gmra.mrb[6].mxu0 %vm141_vm2, %v610_v45 }
 0x520   :  { %3233 = vmatpush3.bf16.msra.mxu0 %v3596_v40  ;;  %2979 = vmatprep.mubr.msk.f32.mxu0 %vm3476_vm1, %v3477_v11 }
 0x521   :  { %3234 = vmatprep.subr.bf16.mxu0 %v3475_v3 }
 0x524   :  { %3236 = vmatpush3.bf16.msra.mxu0 %v3609_v44 }
 0x525   :  { %3243 = vmatprep.subr.bf16.mxu0 %v3475_v3 }
 0x581   :  { %v535_v46 = vpop.permute.xlu0 %534 }
 0x582   :  { %2947 = vmatmul.mubr.msk.f32.vlgmr.msra.gmra.mrb[4].mxu1 %vm141_vm2, %v535_v46 }
 0x583   :  { %3227 = vmatpush3.bf16.msra.mxu1 %v3528_v7  ;;  %2968 = vmatprep.mubr.msk.f32.mxu1 %vm3476_vm1, %v3477_v11 }
 0x584   :  { %3228 = vmatprep.subr.bf16.mxu1 %v3475_v3 }
 0x587   :  { %3230 = vmatpush3.bf16.msra.mxu1 %v3546_v13 }
 0x588   :  { %3237 = vmatprep.subr.bf16.mxu1 %v3475_v3 }
 0x58a   :  { %2969 = vmatmul.mubr.msk.f32.vlgmr.msra.gmra.mrb[6].mxu1 %vm141_vm2, %v535_v46 }
 0x58b   :  { %3239 = vmatpush3.bf16.msra.mxu1 %v3585_v36  ;;  %2990 = vmatprep.mubr.msk.f32.mxu1 %vm3476_vm1, %v3477_v11 }
 0x58c   :  { %3240 = vmatprep.subr.bf16.mxu1 %v3475_v3 }
 0x58f   :  { %3242 = vmatpush3.bf16.msra.mxu1 %v3605_v43 }
 0x590   :  { %3249 = vmatprep.subr.bf16.mxu1 %v3475_v3 }
 0x5f2   :  { %v679_v47 = vpop.f32.mrb[6].mxu0 }
 0x5f3   :  { %v690_v48 = vadd.f32 %v679_v47, %v3632_v54  ;;  %v2959_v49 = vpop.f32.mrb[7].mxu0 }
 0x5f5   :  { %692 = vrot.lane.b32.xlu1 %v690_v48, %s3478_s13 }
 0x655   :  { %v604_v50 = vpop.f32.mrb[4].mxu1 }
 0x656   :  { %v605_v51 = vadd.f32 %v3653_v57, %v604_v50  ;;  %v2948_v52 = vpop.f32.mrb[5].mxu1 }
 0x658   :  { %v683_v53 = vadd.f32 %v679_v47, %v605_v51 }
 0x65a   :  { %v2712_v55 = vmul.f32 -1.442695, %v683_v53 }
 0x65c   :  { %3372 = vpow2.f32 %v2712_v55 }
 0x65d   :  { %v783_v56 = vpop.f32.mrb[6].mxu1 }
 0x65e   :  { %v797_v58 = vadd.f32 %v783_v56, %v3565_v17  ;;  %v2970_v59 = vpop.f32.mrb[7].mxu1  ;;  %v788_v2 = vrot.slane %v783_v56, 4 }
 0x660   :  { %v799_v60 = vrot.slane %v797_v58, 4  ;;  %v790_v4 = vadd.f32 %v788_v2, %v3571_v23 }
 0x662   :  { %800 = vrot.lane.b32.xlu0 %v799_v60, %s3478_s13  ;;  %v2714_v5 = vmul.f32 -1.442695, %v790_v4 }
 0x666   :  { %v3373_v61 = vpop.eup %3372 }
 0x667   :  { %v687_v62 = vadd.f32 1.0, %v3373_v61  ;;  %v693_v0 = vpop.permute.xlu1 %692 }
 0x669   :  { %3374 = vrcp.f32 %v687_v62 }
 0x66a   :  { %3376 = vpow2.f32 %v2714_v5 }
 0x673   :  { %v3375_v63 = vpop.eup %3374 }
 0x674   :  { %v695_v1 = vmul.f32 %v3375_v63, %v693_v0  ;;  %v3377_v6 = vpop.eup %3376  ;;  %v702_v22 = vsub.f32 1.0, %v3375_v63  ;;  %v708_v25 = vmul.f32 %v3375_v63, %v3664_v33 }
 0x675   :  { %v794_v8 = vadd.f32 1.0, %v3377_v6 }
 0x676   :  { %697 = vrot.lane.b32.xlu1 %v695_v1, %s3478_s13 }
 0x677   :  { %3378 = vrcp.f32 %v794_v8 }
 0x681   :  { %v3379_v9 = vpop.eup %3378 }
 0x682   :  { %v810_v29 = vsub.f32 1.0, %v3379_v9  ;;  %v818_v31 = vmul.f32 %v3379_v9, %v816_v28 }
 0x6d4   :  { %v801_v10 = vpop.permute.xlu0 %800 }
 0x6d5   :  { %v803_v12 = vmul.f32 %v3379_v9, %v801_v10 }
 0x6d7   :  { %805 = vrot.lane.b32.xlu0 %v803_v12, %s3478_s13 }
 0x6e8   :  { %v698_v14 = vpop.permute.xlu1 %697 }
 0x6e9   :  { %v700_v15 = vadd.f32 %v698_v14, %v605_v51 }
 0x6eb   :  { %3380 = vtanh.f32 %v700_v15 }
 0x6f5   :  { %v3381_v16 = vpop.eup %3380 }
 0x6f6   :  { %704 = vrot.lane.b32.xlu1 %v3381_v16, %s3479_s6 }
 0x749   :  { %v806_v19 = vpop.permute.xlu0 %805 }
 0x74a   :  { %v808_v20 = vadd.f32 %v806_v19, %v3571_v23 }
 0x74c   :  { %3382 = vtanh.f32 %v808_v20 }
 0x756   :  { %v3383_v21 = vpop.eup %3382 }
 0x757   :  { %812 = vrot.lane.b32.xlu0 %v3383_v21, %s3479_s6 }
 0x768   :  { %v705_v24 = vpop.permute.xlu1 %704 }
 0x769   :  { %v707_v26 = vmul.f32 %v705_v24, %v702_v22 }
 0x76b   :  { %v3706_v27 = vadd.f32 %v708_v25, %v707_v26 }
 0x76d   :  { %897 = vrot.lane.b32.xlu1 %v3706_v27, %s3479_s6 }
 0x7c9   :  { %v813_v30 = vpop.permute.xlu0 %812 }
 0x7ca   :  { %v815_v32 = vmul.f32 %v813_v30, %v810_v29 }
 0x7cc   :  { %v3711_v34 = vadd.f32 %v818_v31, %v815_v32 }
 0x7ce   :  { %v821_v35 = vrot.slane %v3711_v34, 4  ;;  %v1104_v22 = vrot.slane %v3711_v34, 6 }
 0x7d0   :  { %822 = vrot.lane.b32.xlu0 %v821_v35, %s3479_s6 }
 0x7df   :  { %v898_v37 = vpop.permute.xlu1 %897 }
 0x7e0   :  { %2991 = vmatmul.mubr.msk.f32.vlgmr.msra.gmra.mrb[8].mxu1 %vm141_vm2, %v898_v37 }
 0x7e1   :  { %3251 = vmatpush3.bf16.msra.mxu1 %v3596_v40  ;;  %3012 = vmatprep.mubr.msk.f32.mxu1 %vm3476_vm1, %v3477_v11 }
 0x7e2   :  { %3252 = vmatprep.subr.bf16.mxu1 %v3475_v3 }
 0x7e5   :  { %3254 = vmatpush3.bf16.msra.mxu1 %v3609_v44 }
 0x7e6   :  { %3261 = vmatprep.subr.bf16.mxu1 %v3475_v3 }
 0x842   :  { %v823_v38 = vpop.permute.xlu0 %822 }
 0x843   :  { %2980 = vmatmul.mubr.msk.f32.vlgmr.msra.gmra.mrb[8].mxu0 %vm141_vm2, %v823_v38 }
 0x844   :  { %3245 = vmatpush3.bf16.msra.mxu0 %v3528_v7  ;;  %3001 = vmatprep.mubr.msk.f32.mxu0 %vm3476_vm1, %v3477_v11 }
 0x845   :  { %3246 = vmatprep.subr.bf16.mxu0 %v3475_v3 }
 0x848   :  { %3248 = vmatpush3.bf16.msra.mxu0 %v3546_v13 }
 0x849   :  { %3255 = vmatprep.subr.bf16.mxu0 %v3475_v3 }
 0x84b   :  { %3002 = vmatmul.mubr.msk.f32.vlgmr.msra.gmra.mrb[10].mxu0 %vm141_vm2, %v823_v38 }
 0x84c   :  { %3257 = vmatpush3.bf16.msra.mxu0 %v3585_v36  ;;  %3023 = vmatprep.mubr.msk.f32.mxu0 %vm3476_vm1, %v3477_v11 }
 0x84d   :  { %3258 = vmatprep.subr.bf16.mxu0 %v3475_v3 }
 0x850   :  { %3260 = vmatpush3.bf16.msra.mxu0 %v3605_v43 }
 0x851   :  { %3267 = vmatprep.subr.bf16.mxu0 %v3475_v3 }
 0x8b3   :  { %v967_v39 = vpop.f32.mrb[8].mxu1 }
 0x8b4   :  { %v978_v41 = vadd.f32 %v967_v39, %v3632_v54  ;;  %v2992_v42 = vpop.f32.mrb[9].mxu1 }
 0x8b6   :  { %980 = vrot.lane.b32.xlu1 %v978_v41, %s3478_s13 }
 0x916   :  { %v892_v45 = vpop.f32.mrb[8].mxu0 }
 0x917   :  { %v893_v46 = vadd.f32 %v3653_v57, %v892_v45  ;;  %v2981_v47 = vpop.f32.mrb[9].mxu0 }
 0x919   :  { %v971_v48 = vadd.f32 %v967_v39, %v893_v46 }
 0x91b   :  { %v2717_v49 = vmul.f32 -1.442695, %v971_v48 }
 0x91d   :  { %3384 = vpow2.f32 %v2717_v49 }
 0x91e   :  { %v1071_v50 = vpop.f32.mrb[10].mxu0 }
 0x91f   :  { %v1085_v51 = vadd.f32 %v1071_v50, %v3565_v17  ;;  %v3003_v52 = vpop.f32.mrb[11].mxu0  ;;  %v1076_v61 = vrot.slane %v1071_v50, 2 }
 0x921   :  { %v1087_v53 = vrot.slane %v1085_v51, 2  ;;  %v1078_v62 = vadd.f32 %v1076_v61, %v3571_v23 }
 0x923   :  { %1088 = vrot.lane.b32.xlu0 %v1087_v53, %s3478_s13  ;;  %v2719_v63 = vmul.f32 -1.442695, %v1078_v62 }
 0x927   :  { %v3385_v55 = vpop.eup %3384 }
 0x928   :  { %v975_v56 = vadd.f32 1.0, %v3385_v55  ;;  %v981_v59 = vpop.permute.xlu1 %980 }
 0x92a   :  { %3386 = vrcp.f32 %v975_v56 }
 0x92b   :  { %3388 = vpow2.f32 %v2719_v63 }
 0x934   :  { %v3387_v58 = vpop.eup %3386 }
 0x935   :  { %v983_v60 = vmul.f32 %v3387_v58, %v981_v59  ;;  %v3389_v0 = vpop.eup %3388  ;;  %v990_v15 = vsub.f32 1.0, %v3387_v58  ;;  %v996_v19 = vmul.f32 %v3387_v58, %v3706_v27 }
 0x936   :  { %v1082_v1 = vadd.f32 1.0, %v3389_v0 }
 0x937   :  { %985 = vrot.lane.b32.xlu1 %v983_v60, %s3478_s13 }
 0x938   :  { %3390 = vrcp.f32 %v1082_v1 }
 0x942   :  { %v3391_v2 = vpop.eup %3390 }
 0x943   :  { %v1098_v24 = vsub.f32 1.0, %v3391_v2  ;;  %v1106_v26 = vmul.f32 %v3391_v2, %v1104_v22 }
 0x995   :  { %v1089_v4 = vpop.permute.xlu0 %1088 }
 0x996   :  { %v1091_v5 = vmul.f32 %v3391_v2, %v1089_v4 }
 0x998   :  { %1093 = vrot.lane.b32.xlu0 %v1091_v5, %s3478_s13 }
 0x9a9   :  { %v986_v6 = vpop.permute.xlu1 %985 }
 0x9aa   :  { %v988_v8 = vadd.f32 %v986_v6, %v893_v46 }
 0x9ac   :  { %3392 = vtanh.f32 %v988_v8 }
 0x9b6   :  { %v3393_v9 = vpop.eup %3392 }
 0x9b7   :  { %992 = vrot.lane.b32.xlu1 %v3393_v9, %s3479_s6 }
 0xa0a   :  { %v1094_v10 = vpop.permute.xlu0 %1093 }
 0xa0b   :  { %v1096_v12 = vadd.f32 %v1094_v10, %v3571_v23 }
 0xa0d   :  { %3394 = vtanh.f32 %v1096_v12 }
 0xa17   :  { %v3395_v14 = vpop.eup %3394 }
 0xa18   :  { %1100 = vrot.lane.b32.xlu0 %v3395_v14, %s3479_s6 }
 0xa29   :  { %v993_v16 = vpop.permute.xlu1 %992 }
 0xa2a   :  { %v995_v20 = vmul.f32 %v993_v16, %v990_v15 }
 0xa2c   :  { %v3748_v21 = vadd.f32 %v996_v19, %v995_v20 }
 0xa2e   :  { %1185 = vrot.lane.b32.xlu1 %v3748_v21, %s3479_s6 }
 0xa8a   :  { %v1101_v25 = vpop.permute.xlu0 %1100 }
 0xa8b   :  { %v1103_v23 = vmul.f32 %v1101_v25, %v1098_v24 }
 0xa8d   :  { %v3753_v28 = vadd.f32 %v1106_v26, %v1103_v23 }
 0xa8f   :  { %v1109_v29 = vrot.slane %v3753_v28, 6 }
 0xa91   :  { %1110 = vrot.lane.b32.xlu0 %v1109_v29, %s3479_s6 }
 0xaa0   :  { %v1186_v30 = vpop.permute.xlu1 %1185 }
 0xaa1   :  { %3024 = vmatmul.mubr.msk.f32.vlgmr.msra.gmra.mrb[12].mxu0 %vm141_vm2, %v1186_v30 }
 0xaa2   :  { %3269 = vmatpush3.bf16.msra.mxu0 %v3596_v40  ;;  %3045 = vmatprep.mubr.msk.f32.mxu0 %vm3476_vm1, %v3477_v11 }
 0xaa3   :  { %3270 = vmatprep.subr.bf16.mxu0 %v3475_v3 }
 0xaa6   :  { %3272 = vmatpush3.bf16.msra.mxu0 %v3609_v44 }
 0xaa7   :  { %3279 = vmatprep.subr.bf16.mxu0 %v3475_v3 }
 0xb03   :  { %v1111_v31 = vpop.permute.xlu0 %1110 }
 0xb04   :  { %3013 = vmatmul.mubr.msk.f32.vlgmr.msra.gmra.mrb[10].mxu1 %vm141_vm2, %v1111_v31 }
 0xb05   :  { %3263 = vmatpush3.bf16.msra.mxu1 %v3528_v7  ;;  %3034 = vmatprep.mubr.msk.f32.mxu1 %vm3476_vm1, %v3477_v11 }
 0xb06   :  { %3264 = vmatprep.subr.bf16.mxu1 %v3475_v3 }
 0xb09   :  { %3266 = vmatpush3.bf16.msra.mxu1 %v3546_v13 }
 0xb0a   :  { %3273 = vmatprep.subr.bf16.mxu1 %v3475_v3 }
 0xb0c   :  { %3035 = vmatmul.mubr.msk.f32.vlgmr.msra.gmra.mrb[12].mxu1 %vm141_vm2, %v1111_v31 }
 0xb0d   :  { %3275 = vmatpush3.bf16.msra.mxu1 %v3585_v36  ;;  %3056 = vmatprep.mubr.msk.f32.mxu1 %vm3476_vm1, %v3477_v11 }
 0xb0e   :  { %3276 = vmatprep.subr.bf16.mxu1 %v3475_v3 }
 0xb11   :  { %3278 = vmatpush3.bf16.msra.mxu1 %v3605_v43 }
 0xb12   :  { %3285 = vmatprep.subr.bf16.mxu1 %v3475_v3 }
 0xb74   :  { %v1255_v32 = vpop.f32.mrb[12].mxu0 }
 0xb75   :  { %v1266_v34 = vadd.f32 %v1255_v32, %v3632_v54  ;;  %v3025_v35 = vpop.f32.mrb[13].mxu0 }
 0xb77   :  { %1268 = vrot.lane.b32.xlu1 %v1266_v34, %s3478_s13 }
 0xbd7   :  { %v1180_v37 = vpop.f32.mrb[10].mxu1 }
 0xbd8   :  { %v1181_v38 = vadd.f32 %v3653_v57, %v1180_v37  ;;  %v3014_v39 = vpop.f32.mrb[11].mxu1 }
 0xbda   :  { %v1259_v41 = vadd.f32 %v1255_v32, %v1181_v38 }
 0xbdc   :  { %v2722_v42 = vmul.f32 -1.442695, %v1259_v41 }
 0xbde   :  { %3396 = vpow2.f32 %v2722_v42 }
 0xbdf   :  { %v1359_v45 = vpop.f32.mrb[12].mxu1 }
 0xbe0   :  { %v1370_v46 = vadd.f32 %v1359_v45, %v3565_v17  ;;  %v3036_v47 = vpop.f32.mrb[13].mxu1  ;;  %v1363_v53 = vadd.f32 %v1359_v45, %v3567_v18 }
 0xbe2   :  { %1372 = vrot.lane.b32.xlu0 %v1370_v46, %s3478_s13  ;;  %v2724_v55 = vmul.f32 -1.442695, %v1363_v53 }
 0xbe8   :  { %v3397_v48 = vpop.eup %3396 }
 0xbe9   :  { %v1263_v49 = vadd.f32 1.0, %v3397_v48  ;;  %v1269_v51 = vpop.permute.xlu1 %1268 }
 0xbeb   :  { %3398 = vrcp.f32 %v1263_v49 }
 0xbec   :  { %3400 = vpow2.f32 %v2724_v55 }
 0xbf5   :  { %v3399_v50 = vpop.eup %3398 }
 0xbf6   :  { %v1271_v52 = vmul.f32 %v3399_v50, %v1269_v51  ;;  %v3401_v56 = vpop.eup %3400  ;;  %v1278_v5 = vsub.f32 1.0, %v3399_v50  ;;  %v1284_v8 = vmul.f32 %v3399_v50, %v3748_v21 }
 0xbf7   :  { %v1367_v58 = vadd.f32 1.0, %v3401_v56 }
 0xbf8   :  { %1273 = vrot.lane.b32.xlu1 %v1271_v52, %s3478_s13 }
 0xbf9   :  { %3402 = vrcp.f32 %v1367_v58 }
 0xc03   :  { %v3403_v59 = vpop.eup %3402 }
 0xc04   :  { %v1382_v12 = vsub.f32 1.0, %v3403_v59  ;;  %v1389_v15 = vmul.f32 %v3403_v59, %v1109_v29 }
 0xc54   :  { %v1373_v60 = vpop.permute.xlu0 %1372 }
 0xc55   :  { %v1375_v61 = vmul.f32 %v3403_v59, %v1373_v60 }
 0xc57   :  { %1377 = vrot.lane.b32.xlu0 %v1375_v61, %s3478_s13 }
 0xc6a   :  { %v1274_v62 = vpop.permute.xlu1 %1273 }
 0xc6b   :  { %v1276_v63 = vadd.f32 %v1274_v62, %v1181_v38 }
 0xc6d   :  { %3404 = vtanh.f32 %v1276_v63 }
 0xc77   :  { %v3405_v0 = vpop.eup %3404 }
 0xc78   :  { %1280 = vrot.lane.b32.xlu1 %v3405_v0, %s3479_s6 }
 0xcc9   :  { %v1378_v1 = vpop.permute.xlu0 %1377 }
 0xcca   :  { %v1380_v2 = vadd.f32 %v1378_v1, %v3567_v18 }
 0xccc   :  { %3406 = vtanh.f32 %v1380_v2 }
 0xcd6   :  { %v3407_v4 = vpop.eup %3406 }
 0xcd7   :  { %1384 = vrot.lane.b32.xlu0 %v3407_v4, %s3479_s6 }
 0xcea   :  { %v1281_v6 = vpop.permute.xlu1 %1280 }
 0xceb   :  { %v1283_v9 = vmul.f32 %v1281_v6, %v1278_v5 }
 0xced   :  { %v3792_v10 = vadd.f32 %v1284_v8, %v1283_v9 }
 0xcef   :  { %1467 = vrot.lane.b32.xlu1 %v3792_v10, %s3479_s6 }
 0xd49   :  { %v1385_v14 = vpop.permute.xlu0 %1384 }
 0xd4a   :  { %v1387_v16 = vmul.f32 %v1385_v14, %v1382_v12 }
 0xd4c   :  { %v3798_v19 = vadd.f32 %v1389_v15, %v1387_v16 }
 0xd4e   :  { %1392 = vrot.lane.b32.xlu0 %v3798_v19, %s3479_s6  ;;  %v1674_v4 = vrot.slane %v3798_v19, 6 }
 0xd61   :  { %v1468_v20 = vpop.permute.xlu1 %1467 }
 0xd62   :  { %3057 = vmatmul.mubr.msk.f32.vlgmr.msra.gmra.mrb[14].mxu1 %vm141_vm2, %v1468_v20 }
 0xd63   :  { %3287 = vmatpush3.bf16.msra.mxu1 %v3596_v40  ;;  %3078 = vmatprep.mubr.msk.f32.mxu1 %vm3476_vm1, %v3477_v11 }
 0xd64   :  { %3288 = vmatprep.subr.bf16.mxu1 %v3475_v3 }
 0xd67   :  { %3290 = vmatpush3.bf16.msra.mxu1 %v3609_v44 }
 0xd68   :  { %3297 = vmatprep.subr.bf16.mxu1 %v3475_v3 }
 0xdc0   :  { %v1393_v22 = vpop.permute.xlu0 %1392 }
 0xdc1   :  { %3046 = vmatmul.mubr.msk.f32.vlgmr.msra.gmra.mrb[14].mxu0 %vm141_vm2, %v1393_v22 }
 0xdc2   :  { %3281 = vmatpush3.bf16.msra.mxu0 %v3528_v7  ;;  %3067 = vmatprep.mubr.msk.f32.mxu0 %vm3476_vm1, %v3477_v11 }
 0xdc3   :  { %3282 = vmatprep.subr.bf16.mxu0 %v3475_v3 }
 0xdc6   :  { %3284 = vmatpush3.bf16.msra.mxu0 %v3546_v13 }
 0xdc7   :  { %3291 = vmatprep.subr.bf16.mxu0 %v3475_v3 }
 0xdc9   :  { %3068 = vmatmul.mubr.msk.f32.vlgmr.msra.gmra.mrb[16].mxu0 %vm141_vm2, %v1393_v22 }
 0xdca   :  { %3293 = vmatpush3.bf16.msra.mxu0 %v3585_v36  ;;  %3089 = vmatprep.mubr.msk.f32.mxu0 %vm3476_vm1, %v3477_v11 }
 0xdcb   :  { %3294 = vmatprep.subr.bf16.mxu0 %v3475_v3 }
 0xdce   :  { %3296 = vmatpush3.bf16.msra.mxu0 %v3605_v43 }
 0xdcf   :  { %3303 = vmatprep.subr.bf16.mxu0 %v3475_v3 }
 0xe35   :  { %v1537_v24 = vpop.f32.mrb[14].mxu1 }
 0xe36   :  { %v1548_v25 = vadd.f32 %v1537_v24, %v3632_v54  ;;  %v3058_v26 = vpop.f32.mrb[15].mxu1 }
 0xe38   :  { %1550 = vrot.lane.b32.xlu0 %v1548_v25, %s3478_s13 }
 0xe94   :  { %v1462_v23 = vpop.f32.mrb[14].mxu0 }
 0xe95   :  { %v1463_v28 = vadd.f32 %v3653_v57, %v1462_v23  ;;  %v3047_v29 = vpop.f32.mrb[15].mxu0 }
 0xe97   :  { %v1541_v30 = vadd.f32 %v1537_v24, %v1463_v28 }
 0xe99   :  { %v2727_v31 = vmul.f32 -1.442695, %v1541_v30 }
 0xe9b   :  { %3408 = vpow2.f32 %v2727_v31 }
 0xe9c   :  { %v1641_v32 = vpop.f32.mrb[16].mxu0 }
 0xe9d   :  { %v1655_v34 = vadd.f32 %v1641_v32, %v3565_v17  ;;  %v3069_v35 = vpop.f32.mrb[17].mxu0  ;;  %v1646_v46 = vrot.slane %v1641_v32, 6 }
 0xe9f   :  { %v1657_v37 = vrot.slane %v1655_v34, 6  ;;  %v1648_v47 = vadd.f32 %v1646_v46, %v3567_v18 }
 0xea1   :  { %1658 = vrot.lane.b32.xlu1 %v1657_v37, %s3478_s13  ;;  %v2729_v48 = vmul.f32 -1.442695, %v1648_v47 }
 0xea5   :  { %v3409_v38 = vpop.eup %3408 }
 0xea6   :  { %v1545_v39 = vadd.f32 1.0, %v3409_v38 }
 0xea8   :  { %3410 = vrcp.f32 %v1545_v39 }
 0xea9   :  { %3412 = vpow2.f32 %v2729_v48 }
 0xeaa   :  { %v1551_v42 = vpop.permute.xlu0 %1550 }
 0xeb2   :  { %v3411_v41 = vpop.eup %3410 }
 0xeb3   :  { %v1553_v45 = vmul.f32 %v3411_v41, %v1551_v42  ;;  %v3413_v49 = vpop.eup %3412  ;;  %v1560_v62 = vsub.f32 1.0, %v3411_v41  ;;  %v1566_v0 = vmul.f32 %v3411_v41, %v3792_v10 }
 0xeb4   :  { %v1652_v50 = vadd.f32 1.0, %v3413_v49 }
 0xeb5   :  { %1555 = vrot.lane.b32.xlu0 %v1553_v45, %s3478_s13 }
 0xeb6   :  { %3414 = vrcp.f32 %v1652_v50 }
 0xec0   :  { %v3415_v51 = vpop.eup %3414 }
 0xec1   :  { %v1668_v5 = vsub.f32 1.0, %v3415_v51  ;;  %v1676_v8 = vmul.f32 %v3415_v51, %v1674_v4 }
 0xf13   :  { %v1659_v52 = vpop.permute.xlu1 %1658 }
 0xf14   :  { %v1661_v53 = vmul.f32 %v3415_v51, %v1659_v52 }
 0xf16   :  { %1663 = vrot.lane.b32.xlu1 %v1661_v53, %s3478_s13 }
 0xf27   :  { %v1556_v55 = vpop.permute.xlu0 %1555 }
 0xf28   :  { %v1558_v56 = vadd.f32 %v1556_v55, %v1463_v28 }
 0xf2a   :  { %3416 = vtanh.f32 %v1558_v56 }
 0xf34   :  { %v3417_v58 = vpop.eup %3416 }
 0xf35   :  { %1562 = vrot.lane.b32.xlu0 %v3417_v58, %s3479_s6 }
 0xf88   :  { %v1664_v59 = vpop.permute.xlu1 %1663 }
 0xf89   :  { %v1666_v60 = vadd.f32 %v1664_v59, %v3567_v18 }
 0xf8b   :  { %3418 = vtanh.f32 %v1666_v60 }
 0xf95   :  { %v3419_v61 = vpop.eup %3418 }
 0xf96   :  { %1670 = vrot.lane.b32.xlu1 %v3419_v61, %s3479_s6 }
 0xfa7   :  { %v1563_v63 = vpop.permute.xlu0 %1562 }
 0xfa8   :  { %v1565_v1 = vmul.f32 %v1563_v63, %v1560_v62 }
 0xfaa   :  { %v3835_v2 = vadd.f32 %v1566_v0, %v1565_v1 }
 0xfac   :  { %1755 = vrot.lane.b32.xlu0 %v3835_v2, %s3479_s6 }
0x1008   :  { %v1671_v6 = vpop.permute.xlu1 %1670 }
0x1009   :  { %v1673_v9 = vmul.f32 %v1671_v6, %v1668_v5 }
0x100b   :  { %v3840_v12 = vadd.f32 %v1676_v8, %v1673_v9 }
0x100d   :  { %v1679_v14 = vrot.slane %v3840_v12, 2  ;;  %v1962_v0 = vrot.slane %v3840_v12, 6 }
0x100f   :  { %1680 = vrot.lane.b32.xlu1 %v1679_v14, %s3479_s6 }
0x101e   :  { %v1756_v15 = vpop.permute.xlu0 %1755 }
0x101f   :  { %3090 = vmatmul.mubr.msk.f32.vlgmr.msra.gmra.mrb[18].mxu0 %vm141_vm2, %v1756_v15 }
0x1020   :  { %3305 = vmatpush3.bf16.msra.mxu0 %v3596_v40  ;;  %3111 = vmatprep.mubr.msk.f32.mxu0 %vm3476_vm1, %v3477_v11 }
0x1021   :  { %3306 = vmatprep.subr.bf16.mxu0 %v3475_v3 }
0x1024   :  { %3308 = vmatpush3.bf16.msra.mxu0 %v3609_v44 }
0x1025   :  { %3315 = vmatprep.subr.bf16.mxu0 %v3475_v3 }
0x1081   :  { %v1681_v16 = vpop.permute.xlu1 %1680 }
0x1082   :  { %3079 = vmatmul.mubr.msk.f32.vlgmr.msra.gmra.mrb[16].mxu1 %vm141_vm2, %v1681_v16 }
0x1083   :  { %3299 = vmatpush3.bf16.msra.mxu1 %v3528_v7  ;;  %3100 = vmatprep.mubr.msk.f32.mxu1 %vm3476_vm1, %v3477_v11 }
0x1084   :  { %3300 = vmatprep.subr.bf16.mxu1 %v3475_v3 }
0x1087   :  { %3302 = vmatpush3.bf16.msra.mxu1 %v3546_v13 }
0x1088   :  { %3309 = vmatprep.subr.bf16.mxu1 %v3475_v3 }
0x108a   :  { %3101 = vmatmul.mubr.msk.f32.vlgmr.msra.gmra.mrb[18].mxu1 %vm141_vm2, %v1681_v16 }
0x108b   :  { %3311 = vmatpush3.bf16.msra.mxu1 %v3585_v36  ;;  %3122 = vmatprep.mubr.msk.f32.mxu1 %vm3476_vm1, %v3477_v11 }
0x108c   :  { %3312 = vmatprep.subr.bf16.mxu1 %v3475_v3 }
0x108f   :  { %3314 = vmatpush3.bf16.msra.mxu1 %v3605_v43 }
0x1090   :  { %3321 = vmatprep.subr.bf16.mxu1 %v3475_v3 }
0x10f2   :  { %v1825_v19 = vpop.f32.mrb[18].mxu0 }
0x10f3   :  { %v1836_v20 = vadd.f32 %v1825_v19, %v3632_v54  ;;  %v3091_v22 = vpop.f32.mrb[19].mxu0 }
0x10f5   :  { %1838 = vrot.lane.b32.xlu0 %v1836_v20, %s3478_s13 }
0x1155   :  { %v1750_v24 = vpop.f32.mrb[16].mxu1 }
0x1156   :  { %v1751_v25 = vadd.f32 %v3653_v57, %v1750_v24  ;;  %v3080_v26 = vpop.f32.mrb[17].mxu1 }
0x1158   :  { %v1829_v23 = vadd.f32 %v1825_v19, %v1751_v25 }
0x115a   :  { %v2732_v28 = vmul.f32 -1.442695, %v1829_v23 }
0x115c   :  { %3420 = vpow2.f32 %v2732_v28 }
0x115d   :  { %v1929_v29 = vpop.f32.mrb[18].mxu1 }
0x115e   :  { %v1943_v30 = vadd.f32 %v1929_v29, %v3565_v17  ;;  %v3102_v31 = vpop.f32.mrb[19].mxu1  ;;  %v1934_v41 = vrot.slane %v1929_v29, 4 }
0x1160   :  { %v1945_v32 = vrot.slane %v1943_v30, 4  ;;  %v1936_v42 = vadd.f32 %v1934_v41, %v3567_v18 }
0x1162   :  { %1946 = vrot.lane.b32.xlu1 %v1945_v32, %s3478_s13  ;;  %v2734_v45 = vmul.f32 -1.442695, %v1936_v42 }
0x1166   :  { %v3421_v34 = vpop.eup %3420 }
0x1167   :  { %v1833_v35 = vadd.f32 1.0, %v3421_v34  ;;  %v1839_v38 = vpop.permute.xlu0 %1838 }
0x1169   :  { %3422 = vrcp.f32 %v1833_v35 }
0x116a   :  { %3424 = vpow2.f32 %v2734_v45 }
0x1173   :  { %v3423_v37 = vpop.eup %3422 }
0x1174   :  { %v1841_v39 = vmul.f32 %v3423_v37, %v1839_v38  ;;  %v3425_v46 = vpop.eup %3424  ;;  %v1848_v59 = vsub.f32 1.0, %v3423_v37  ;;  %v1854_v61 = vmul.f32 %v3423_v37, %v3835_v2 }
0x1175   :  { %v1940_v47 = vadd.f32 1.0, %v3425_v46 }
0x1176   :  { %1843 = vrot.lane.b32.xlu0 %v1841_v39, %s3478_s13 }
0x1177   :  { %3426 = vrcp.f32 %v1940_v47 }
0x1181   :  { %v3427_v48 = vpop.eup %3426 }
0x1182   :  { %v1956_v1 = vsub.f32 1.0, %v3427_v48  ;;  %v1964_v5 = vmul.f32 %v3427_v48, %v1962_v0  ;;  %v52_v0 = vld [vmem:[%s4005_s0] sm:$0x3] }
0x1183   :  { %vm422_vm3 = vcmp.eq.s32.totalorder %v52_v0, 1  ;;  %vm1286_vm4 = vcmp.eq.s32.totalorder %v52_v0, 4  ;;  %vm1856_vm5 = vcmp.eq.s32.totalorder %v52_v0, 6  ;;  %vm2432_vm6 = vcmp.eq.s32.totalorder %v52_v0, 8 }
0x1184   :  { %vm710_vm7 = vcmp.eq.s32.totalorder %v52_v0, 2  ;;  %vm998_vm8 = vcmp.eq.s32.totalorder %v52_v0, 3  ;;  %vm1568_vm9 = vcmp.eq.s32.totalorder %v52_v0, 5  ;;  %vm2144_vm10 = vcmp.eq.s32.totalorder %v52_v0, 7 }
0x11d4   :  { %v1947_v49 = vpop.permute.xlu1 %1946 }
0x11d5   :  { %v1949_v50 = vmul.f32 %v3427_v48, %v1947_v49 }
0x11d7   :  { %1951 = vrot.lane.b32.xlu1 %v1949_v50, %s3478_s13 }
0x11e8   :  { %v1844_v51 = vpop.permute.xlu0 %1843 }
0x11e9   :  { %v1846_v52 = vadd.f32 %v1844_v51, %v1751_v25 }
0x11eb   :  { %3428 = vtanh.f32 %v1846_v52 }
0x11f5   :  { %v3429_v53 = vpop.eup %3428 }
0x11f6   :  { %1850 = vrot.lane.b32.xlu0 %v3429_v53, %s3479_s6 }
0x1249   :  { %v1952_v55 = vpop.permute.xlu1 %1951 }
0x124a   :  { %v1954_v56 = vadd.f32 %v1952_v55, %v3567_v18 }
0x124c   :  { %3430 = vtanh.f32 %v1954_v56 }
0x1256   :  { %v3431_v58 = vpop.eup %3430 }
0x1257   :  { %1958 = vrot.lane.b32.xlu1 %v3431_v58, %s3479_s6 }
0x1268   :  { %v1851_v60 = vpop.permute.xlu0 %1850 }
0x1269   :  { %v1853_v62 = vmul.f32 %v1851_v60, %v1848_v59 }
0x126b   :  { %v3877_v63 = vadd.f32 %v1854_v61, %v1853_v62  ;;  %v3480_v61 = vmov 0  }
0x126c   :  { %3352 = vset.pattern.permute.xlu0 %v3480_v61  ;;  %3353 = vset.pattern.permute.xlu1 %v3480_v61 }
0x126d   :  { %2043 = vrot.lane.b32.xlu0 %v3877_v63, %s3479_s6 }
0x12c9   :  { %v1959_v4 = vpop.permute.xlu1 %1958 }
0x12ca   :  { %v1961_v6 = vmul.f32 %v1959_v4, %v1956_v1 }
0x12cc   :  { %v3882_v8 = vadd.f32 %v1964_v5, %v1961_v6  ;;  %v423_v6 = vsel %vm422_vm3, 1, %v3480_v61 }
0x12ce   :  { %v1967_v9 = vrot.slane %v3882_v8, 4  ;;  %v2250_v52 = vrot.slane %v3882_v8, 6  ;;  %v1287_v8 = vsel %vm1286_vm4, 1, %v3480_v61 }
0x12d0   :  { %1968 = vrot.lane.b32.xlu1 %v1967_v9, %s3479_s6  ;;  %v1857_v9 = vsel %vm1856_vm5, 1, %v3480_v61  ;;  %vm2683_vm5 = vcmask 254976  }
0x12df   :  { %v2044_v14 = vpop.permute.xlu0 %2043 }
0x12e0   :  { %3123 = vmatmul.mubr.msk.f32.vlgmr.msra.gmra.mrb[20].mxu1 %vm141_vm2, %v2044_v14  ;;  %v2433_v14 = vsel %vm2432_vm6, 1, %v3480_v61 }
0x12e1   :  { %3323 = vmatpush3.bf16.msra.mxu1 %v3596_v40  ;;  %3144 = vmatprep.mubr.msk.f32.mxu1 %vm3476_vm1, %v3477_v11 }
0x12e2   :  { %3324 = vmatprep.subr.bf16.mxu1 %v3475_v3 }
0x12e5   :  { %3326 = vmatpush3.bf16.msra.mxu1 %v3609_v44 }
0x12e6   :  { %3158 = vmatprep.subr.mxu1 %v3477_v11 }
0x1342   :  { %v1969_v12 = vpop.permute.xlu1 %1968 }
0x1343   :  { %3112 = vmatmul.mubr.msk.f32.vlgmr.msra.gmra.mrb[20].mxu0 %vm141_vm2, %v1969_v12 }
0x1344   :  { %3317 = vmatpush3.bf16.msra.mxu0 %v3528_v7  ;;  %3133 = vmatprep.mubr.msk.f32.mxu0 %vm3476_vm1, %v3477_v11 }
0x1345   :  { %3318 = vmatprep.subr.bf16.mxu0 %v3475_v3 }
0x1348   :  { %3320 = vmatpush3.bf16.msra.mxu0 %v3546_v13 }
0x1349   :  { %3327 = vmatprep.subr.bf16.mxu0 %v3475_v3 }
0x134b   :  { %3134 = vmatmul.mubr.msk.f32.vlgmr.msra.gmra.mrb[22].mxu0 %vm141_vm2, %v1969_v12 }
0x134c   :  { %3329 = vmatpush3.bf16.msra.mxu0 %v3585_v36  ;;  %3155 = vmatprep.mubr.msk.f32.mxu0 %vm3476_vm1, %v3477_v11 }
0x134d   :  { %3330 = vmatprep.subr.bf16.mxu0 %v3475_v3 }
0x1350   :  { %3332 = vmatpush3.bf16.msra.mxu0 %v3605_v43 }
0x1351   :  { %3339 = vmatprep.subr.bf16.mxu0 %v3475_v3 }
0x13b3   :  { %v2113_v7 = vpop.f32.mrb[20].mxu1 }
0x13b4   :  { %v2124_v40 = vadd.f32 %v2113_v7, %v3632_v54  ;;  %v3124_v44 = vpop.f32.mrb[21].mxu1 }
0x13b6   :  { %2126 = vrot.lane.b32.xlu0 %v2124_v40, %s3478_s13 }
0x1416   :  { %v2038_v13 = vpop.f32.mrb[20].mxu0 }
0x1417   :  { %v2039_v15 = vadd.f32 %v3653_v57, %v2038_v13  ;;  %v3113_v16 = vpop.f32.mrb[21].mxu0 }
0x1419   :  { %v2117_v36 = vadd.f32 %v2113_v7, %v2039_v15 }
0x141b   :  { %v2737_v19 = vmul.f32 -1.442695, %v2117_v36 }
0x141d   :  { %3432 = vpow2.f32 %v2737_v19 }
0x141e   :  { %v2217_v20 = vpop.f32.mrb[22].mxu0 }
0x141f   :  { %v2231_v22 = vadd.f32 %v2217_v20, %v3565_v17  ;;  %v3135_v24 = vpop.f32.mrb[23].mxu0  ;;  %v2222_v57 = vrot.slane %v2217_v20, 2 }
0x1420   :  { %v999_v24 = vsel %vm998_vm8, 1, %v3480_v61 }
0x1421   :  { %v2233_v43 = vrot.slane %v2231_v22, 2  ;;  %v2224_v30 = vadd.f32 %v2222_v57, %v3567_v18  ;;  %v711_v22 = vsel %vm710_vm7, 1, %v3480_v61  ;;  %v2439_v57 = vld [vmem:[%s4009_s4] sm:$0xff] }
0x1423   :  { %2234 = vrot.lane.b32.xlu1 %v2233_v43, %s3478_s13  ;;  %v2739_v31 = vmul.f32 -1.442695, %v2224_v30  ;;  %v1569_v43 = vsel %vm1568_vm9, 1, %v3480_v61  ;;  %v2440_v30 = vld [vmem:[%s4009_s4 + $0x8] sm:$0xff] }
0x1427   :  { %v3433_v25 = vpop.eup %3432 }
0x1428   :  { %v2121_v26 = vadd.f32 1.0, %v3433_v25  ;;  %v2127_v28 = vpop.permute.xlu0 %2126  ;;  %v2145_v25 = vsel %vm2144_vm10, 1, %v3480_v61 }
0x142a   :  { %3434 = vrcp.f32 %v2121_v26 }
0x142b   :  { %3436 = vpow2.f32 %v2739_v31  ;;  %v2441_v31 = vld [vmem:[%s4009_s4 + $0x10] sm:$0xff] }
0x1434   :  { %v3435_v23 = vpop.eup %3434 }
0x1435   :  { %v2129_v29 = vmul.f32 %v3435_v23, %v2127_v28  ;;  %v3437_v32 = vpop.eup %3436  ;;  %v2136_v47 = vsub.f32 1.0, %v3435_v23  ;;  %v2142_v49 = vmul.f32 %v3435_v23, %v3877_v63  ;;  %v2447_v28 = vld [vmem:[%s4009_s4 + $0x40] sm:$0xff] }
0x1436   :  { %v2228_v34 = vadd.f32 1.0, %v3437_v32  ;;  %v2442_v32 = vld [vmem:[%s4009_s4 + $0x18] sm:$0xff] }
0x1437   :  { %2131 = vrot.lane.b32.xlu0 %v2129_v29, %s3478_s13  ;;  %v2450_v29 = vld [vmem:[%s4007_s2] sm:$0x3] }
0x1438   :  { %3438 = vrcp.f32 %v2228_v34  ;;  %v3334_v34 = vpack.c.bf16 %v2440_v30, %v2439_v57 }
0x1442   :  { %v3439_v17 = vpop.eup %3438 }
0x1443   :  { %v2244_v53 = vsub.f32 1.0, %v3439_v17  ;;  %v2252_v56 = vmul.f32 %v3439_v17, %v2250_v52 }
0x1495   :  { %v2235_v35 = vpop.permute.xlu1 %2234 }
0x1496   :  { %v2237_v37 = vmul.f32 %v3439_v17, %v2235_v35  ;;  %v3337_v17 = vpack.c.bf16 %v2442_v32, %v2441_v31 }
0x1498   :  { %2239 = vrot.lane.b32.xlu1 %v2237_v37, %s3478_s13 }
0x14a9   :  { %v2132_v38 = vpop.permute.xlu0 %2131 }
0x14aa   :  { %v2134_v39 = vadd.f32 %v2132_v38, %v2039_v15 }
0x14ac   :  { %3440 = vtanh.f32 %v2134_v39 }
0x14b6   :  { %v3441_v41 = vpop.eup %3440 }
0x14b7   :  { %2138 = vrot.lane.b32.xlu0 %v3441_v41, %s3479_s6 }
0x150a   :  { %v2240_v42 = vpop.permute.xlu1 %2239 }
0x150b   :  { %v2242_v45 = vadd.f32 %v2240_v42, %v3567_v18 }
0x150d   :  { %3442 = vtanh.f32 %v2242_v45 }
0x1517   :  { %v3443_v46 = vpop.eup %3442 }
0x1518   :  { %2246 = vrot.lane.b32.xlu1 %v3443_v46, %s3479_s6 }
0x1529   :  { %v2139_v48 = vpop.permute.xlu0 %2138 }
0x152a   :  { %v2141_v50 = vmul.f32 %v2139_v48, %v2136_v47 }
0x152c   :  { %v3919_v51 = vadd.f32 %v2142_v49, %v2141_v50 }
0x152e   :  { %2331 = vrot.lane.b32.xlu0 %v3919_v51, %s3479_s6 }
0x158a   :  { %v2247_v55 = vpop.permute.xlu1 %2246 }
0x158b   :  { %v2249_v18 = vmul.f32 %v2247_v55, %v2244_v53 }
0x158d   :  { %v2253_v58 = vadd.f32 %v2252_v56, %v2249_v18 }
0x158f   :  { %v2255_v59 = vrot.slane %v2253_v58, 6 }
0x1591   :  { %2256 = vrot.lane.b32.xlu1 %v2255_v59, %s3479_s6 }
0x15a0   :  { %v2332_v60 = vpop.permute.xlu0 %2331 }
0x15a1   :  { %3156 = vmatmul.mubr.msk.f32.vlgmr.msra.gmra.mrb[24].mxu0 %vm141_vm2, %v2332_v60 }
0x15a2   :  { %3182 = vmatprep.mubr.msk.f32.mxu0 %vm3476_vm1, %v3477_v11 }
0x1603   :  { %v2257_v62 = vpop.permute.xlu1 %2256 }
0x1604   :  { %3145 = vmatmul.mubr.msk.f32.vlgmr.msra.gmra.mrb[22].mxu1 %vm141_vm2, %v2257_v62  ;;  %v2446_v62 = vld [vmem:[%s4009_s4 + $0x38] sm:$0xff] }
0x1605   :  { %3160 = vmatprep.mubr.msk.f32.mxu1 %vm3476_vm1, %v3477_v11  ;;  %3159 = vmatpush3.msra.mxu1 %v2447_v28 }
0x1606   :  { %3333 = vmatprep.subr.bf16.mxu1 %v3475_v3 }
0x1608   :  { %3161 = vmatmul.mubr.msk.f32.vlgmr.msra.gmra.mrb[24].mxu1 %vm2451_vm11, %v2450_v29 }
0x1609   :  { %3171 = vmatprep.mubr.msk.f32.mxu1 %vm3476_vm1, %v3477_v11  ;;  %3335 = vmatpush3.bf16.msra.mxu1 %v3334_v34 }
0x160a   :  { %3336 = vmatprep.subr.bf16.mxu1 %v3475_v3 }
0x160d   :  { %3338 = vmatpush3.bf16.msra.mxu1 %v3337_v17 }
0x1674   :  { %v2401_v1 = vpop.f32.mrb[24].mxu0 }
0x1675   :  { %v2412_v4 = vadd.f32 %v2401_v1, %v3632_v54  ;;  %v3157_v5 = vpop.f32.mrb[25].mxu0  ;;  %v3450_v54 = vld [vmem:[%s4008_s3 + $0x7a] ss:$0 sm:$0xff] }
0x1677   :  { %2414 = vrot.lane.b32.xlu0 %v2412_v4, %s3478_s13 }
0x167b   :  { %425 = vperm.xlu0 %3352, %v423_v6  }
0x167f   :  { %1289 = vperm.xlu0 %3352, %v1287_v8  }
0x1683   :  { %1859 = vperm.xlu0 %3352, %v1857_v9  }
0x1687   :  { %2435 = vperm.xlu0 %3352, %v2433_v14  }
0x16d7   :  { %v2326_v12 = vpop.f32.mrb[22].mxu1 }
0x16d8   :  { %v2327_v7 = vadd.f32 %v3450_v54, %v2326_v12  ;;  %v3146_v40 = vpop.f32.mrb[23].mxu1 }
0x16da   :  { %v2405_v44 = vadd.f32 %v2401_v1, %v2327_v7  ;;  %v2745_v1 = vld [vmem:[%s4009_s4 + $0x48] ss:$0 sm:$0xff] }
0x16dc   :  { %v2742_v13 = vmul.f32 -1.442695, %v2405_v44 }
0x16de   :  { %3444 = vpow2.f32 %v2742_v13 }
0x16e8   :  { %v3445_v15 = vpop.eup %3444 }
0x16e9   :  { %v2409_v16 = vadd.f32 1.0, %v3445_v15  ;;  %v2415_v19 = vpop.permute.xlu0 %2414 }
0x16eb   :  { %3446 = vrcp.f32 %v2409_v16 }
0x16f5   :  { %v3447_v36 = vpop.eup %3446 }
0x16f6   :  { %v2417_v20 = vmul.f32 %v3447_v36, %v2415_v19  ;;  %v2424_v50 = vsub.f32 1.0, %v3447_v36  ;;  %v2430_v56 = vmul.f32 %v3447_v36, %v3919_v51 }
0x16f8   :  { %2419 = vrot.lane.b32.xlu1 %v2417_v20, %s3478_s13 }
0x16fa   :  { %v426_v39 = vpop.permute.xlu0 %425 }
0x16fb   :  { %vm427_vm12 = vcmp.eq.s32.totalorder %v426_v39, 1 }
0x16fc   :  { %713 = vperm.xlu1 %3353, %v711_v22   ;;  %v428_v45 = vsel %vm427_vm12, %v3664_v33, 0.0 }
0x16fe   :  { %v1290_v42 = vpop.permute.xlu0 %1289 }
0x16ff   :  { %vm1291_vm15 = vcmp.eq.s32.totalorder %v1290_v42, 1 }
0x1700   :  { %1001 = vperm.xlu1 %3353, %v999_v24  }
0x1702   :  { %v1860_v48 = vpop.permute.xlu0 %1859 }
0x1703   :  { %vm1861_vm1 = vcmp.eq.s32.totalorder %v1860_v48, 1 }
0x1704   :  { %1571 = vperm.xlu1 %3353, %v1569_v43  }
0x1706   :  { %v2436_v55 = vpop.permute.xlu0 %2435 }
0x1707   :  { %vm2437_vm4 = vcmp.eq.s32.totalorder %v2436_v55, 1 }
0x1708   :  { %2147 = vperm.xlu1 %3353, %v2145_v25  }
0x176a   :  { %v2420_v26 = vpop.permute.xlu1 %2419 }
0x176b   :  { %v2422_v23 = vadd.f32 %v2420_v26, %v2327_v7 }
0x176d   :  { %3448 = vtanh.f32 %v2422_v23 }
0x1777   :  { %v3449_v35 = vpop.eup %3448 }
0x1778   :  { %2426 = vrot.lane.b32.xlu1 %v3449_v35, %s3479_s6 }
0x177b   :  { %v714_v37 = vpop.permute.xlu1 %713 }
0x177c   :  { %vm715_vm13 = vcmp.eq.s32.totalorder %v714_v37, 1 }
0x177d   :  { %v716_v11 = vsel %vm715_vm13, %v3706_v27, %v428_v45 }
0x177f   :  { %v1002_v38 = vpop.permute.xlu1 %1001 }
0x1780   :  { %vm1003_vm14 = vcmp.eq.s32.totalorder %v1002_v38, 1 }
0x1781   :  { %v1004_v46 = vsel %vm1003_vm14, %v3748_v21, %v716_v11 }
0x1782   :  { %v1292_v49 = vsel %vm1291_vm15, %v3792_v10, %v1004_v46  ;;  %v2521_v10 = vpop.f32.mrb[24].mxu1 }
0x1783   :  { %v1572_v41 = vpop.permute.xlu1 %1571  ;;  %v3162_v59 = vpop.f32.mrb[25].mxu1 }
0x1784   :  { %vm1573_vm0 = vcmp.eq.s32.totalorder %v1572_v41, 1 }
0x1785   :  { %v1574_v52 = vsel %vm1573_vm0, %v3835_v2, %v1292_v49  ;;  %v2443_v2 = vld [vmem:[%s4009_s4 + $0x20] sm:$0xff] }
0x1786   :  { %v1862_v27 = vsel %vm1861_vm1, %v3877_v63, %v1574_v52  ;;  %v2444_v63 = vld [vmem:[%s4009_s4 + $0x28] sm:$0xff] }
0x1787   :  { %v2148_v47 = vpop.permute.xlu1 %2147  ;;  %v3340_v61 = vpack.c.bf16 %v2444_v63, %v2443_v2 }
0x1788   :  { %vm2149_vm3 = vcmp.eq.s32.totalorder %v2148_v47, 1 }
0x1789   :  { %v2150_v21 = vsel %vm2149_vm3, %v3919_v51, %v1862_v27  ;;  %3341 = vmatpush3.bf16.msra.mxu0 %v3340_v61  ;;  %v2445_v51 = vld [vmem:[%s4009_s4 + $0x30] sm:$0xff] }
0x178a   :  { %3342 = vmatprep.subr.bf16.mxu0 %v3475_v3  ;;  %v3343_v0 = vpack.c.bf16 %v2446_v62, %v2445_v51  ;;  %v2746_v3 = vld [vmem:[%s4009_s4 + $0x49] ss:$0 sm:$0xff] }
0x178d   :  { %3344 = vmatpush3.bf16.msra.mxu0 %v3343_v0 }
0x17ea   :  { %v2427_v53 = vpop.permute.xlu1 %2426 }
0x17eb   :  { %v2429_v33 = vmul.f32 %v2427_v53, %v2424_v50 }
0x17ed   :  { %v2431_v18 = vadd.f32 %v2430_v56, %v2429_v33 }
0x17ef   :  { %v2438_v58 = vsel %vm2437_vm4, %v2431_v18, %v2150_v21 }
0x17f0   :  { %2526 = vrot.lane.b32.xlu0 %v2438_v58, %s3479_s6 }
0x1862   :  { %v2527_v60 = vpop.permute.xlu0 %2526 }
0x1863   :  { %3172 = vmatmul.mubr.msk.f32.vlgmr.msra.gmra.mrb[26].mxu1 %vm141_vm2, %v2527_v60 }
0x1936   :  { %v2596_v4 = vpop.f32.mrb[26].mxu1 }
0x1937   :  { %v2597_v5 = vadd.f32 %v2596_v4, %v2521_v10  ;;  %v3173_v6 = vpop.f32.mrb[27].mxu1 }
0x1939   :  { %v2604_v8 = vadd.f32 %v2745_v1, %v2597_v5 }
0x193b   :  { %v2605_v9 = vmax.f32 %v2604_v8, 0.0 }
0x193d   :  { %3183 = vmatmul.mubr.msk.f32.vlgmr.msra.gmra.mrb[26].mxu0 %vm141_vm2, %v2605_v9 }
0x1a10   :  { %v2679_v14 = vpop.f32.mrb[26].mxu0 }
0x1a11   :  { %v2680_v12 = vadd.f32 %v2746_v3, %v2679_v14  ;;  %v3184_v54 = vpop.f32.mrb[27].mxu0 }
0x1a13   :  { %2684 = vst.msk [vmem:[#allocation2] sm:$0x3] %vm2683_vm5, %v2680_v12 }
0x1a14   :  { %3462 = shalt.err (!%p3459_p4)
}
0x1a15   :  { %s3463_s3 = scalar_lea.hbm %s4010_s5, 32 }
0x1a16   :  { %p3464_p5 = scmp.ne.s32.totalorder %s4010_s5, %s3463_s3  ;;  %p3467_p6 = scmp.lt.u32.totalorder %s3463_s3, %s4010_s5 }
0x1a18   :  { %p3469_p7 = pnand %p3467_p6, %p3464_p5 }
0x1a1a   :  { %3472 = shalt.err (!%p3469_p7)
}
0x1a1b   :  { %2694 = dma.vmem_to_hbm [thread:$0]  %s2692_s11, 32, %s4010_s5, [#allocation3]  }
0x1a1c   :  { %3473 = dma.done.wait [#allocation3], 32  }
0x1a1d   :  { %3474 = vsyncadd [#allocation3], 4294967264 }
0x1a1e   :  { %2698 = vsyncpa [#allocation3], 1 }

</bundles_post_ra>
